<compile_context>
chip_gen: v7x
topology: tpu7x:2x2x1
jax: 0.10.0
libtpu: 0.0.40
codegen_flags: <defaults>
</compile_context>

<pallas_src>
import jax
import jax.numpy as jnp
from jax.experimental import pallas as pl
from jax.experimental.pallas import tpu as pltpu


_SQRT_2_OVER_PI = 0.7978845608028654
_INV_SQRT2 = 0.7071067811865476

# tanh-approx GELU runs on the EUP (its own VLIW slot); the exact-erf form is a
# ~20-op VPU polynomial.  Small numeric drift vs nn.GELU()'s erf default.
_USE_TANH_GELU = True


def _gelu(x):
    if _USE_TANH_GELU:
        return 0.5 * x * (1.0 + jnp.tanh(_SQRT_2_OVER_PI * (x + 0.044715 * x * x * x)))
    return 0.5 * x * (1.0 + jax.lax.erf(x * _INV_SQRT2))


def _mutual_film_kernel(zA_ref, zB_ref,
                        w1a_ref, w1b_ref, b1_ref,
                        wA2_ref, bA2_ref, wB2_ref, bB2_ref, wF2_ref, bF2_ref,
                        outA_ref, outB_ref):
    PA = zA_ref.shape[-1]
    PB = zB_ref.shape[-1]
    bf16 = jnp.bfloat16

    zA = zA_ref[...].astype(jnp.float32)
    zB = zB_ref[...].astype(jnp.float32)

    def mm(x, w):
        # bf16 MXU operands, f32 accumulation.
        return jnp.dot(x.astype(bf16), w, preferred_element_type=jnp.float32)

    # film_A2B(z_A): one wide [PH, 2*PB] matmul; gamma/beta split is a
    # 128-aligned lane slice (costs nothing).
    hA = _gelu(mm(zA, w1a_ref[0]) + b1_ref[0])
    pA2B = mm(hA, wA2_ref[...]) + bA2_ref[...]
    zB_mod = pA2B[:, :PB] * zB + pA2B[:, PB:]

    # film_B2A(z_B)
    hB = _gelu(mm(zB, w1b_ref[0]) + b1_ref[1])
    pB2A = mm(hB, wB2_ref[...]) + bB2_ref[...]
    zA_mod = pB2A[:, :PA] * zA + pB2A[:, PA:]

    # fuse(concat([zA_mod, zB_mod])): concat replaced by a K-split pair of
    # matmuls accumulated in f32 (MRB in-place accumulation on v7x).
    hF = _gelu(mm(zA_mod, w1a_ref[1]) + mm(zB_mod, w1b_ref[1]) + b1_ref[2])
    zF = mm(hF, wF2_ref[...]) + bF2_ref[...]

    # Residual adds; both stores are lane-dense (widths are multiples of 128).
    outA_ref[...] = (zA + zF[:, :PA]).astype(outA_ref.dtype)
    outB_ref[...] = (zB + zF[:, PA:]).astype(outB_ref.dtype)


def _pad2d(x, rows, cols):
    return jnp.pad(x, ((0, rows - x.shape[0]), (0, cols - x.shape[1])))


def _lane_pad(n):
    return 128 * pl.cdiv(n, 128)


def prepare_film_params(params, dim_A, dim_B, hidden, *, weight_dtype=jnp.bfloat16):
    """One-time weight prep (hoist this out of the per-call path).

    Per-dim lane padding PA/PB/PH; gamma/beta and residual halves re-merged
    into wide-N slabs with 128-aligned split points; fuse first layer K-split;
    weights cast to bf16 (biases stay f32).
    """
    PA, PB, PH = _lane_pad(dim_A), _lane_pad(dim_B), _lane_pad(hidden)
    f32 = jnp.float32

    def wpad(w, rows, cols):
        return _pad2d(jnp.asarray(w, f32), rows, cols).astype(weight_dtype)

    def bpad(b, cols):
        b = jnp.asarray(b, f32).reshape(1, -1)
        return _pad2d(b, 1, cols)

    wF1 = jnp.asarray(params["wF1"], f32)
    # First-layer weights ([in, out] layout); fuse's wF1 is K-split at dim_A.
    W1A = jnp.stack([wpad(params["wA1"], PA, PH), wpad(wF1[:dim_A], PA, PH)])   # [2,PA,PH]
    W1B = jnp.stack([wpad(params["wB1"], PB, PH), wpad(wF1[dim_A:], PB, PH)])   # [2,PB,PH]
    B1 = jnp.stack([bpad(params["bA1"], PH), bpad(params["bB1"], PH),
                    bpad(params["bF1"], PH)])                                   # [3,1,PH]

    def nsplit(w, b, split, p_left, p_right):
        w = jnp.asarray(w, f32)
        b = jnp.asarray(b, f32).reshape(-1)
        w_packed = jnp.concatenate(
            [wpad(w[:, :split], PH, p_left), wpad(w[:, split:], PH, p_right)], axis=1)
        b_packed = jnp.concatenate(
            [bpad(b[:split], p_left), bpad(b[split:], p_right)], axis=1)
        return w_packed, b_packed

    WA2, bA2 = nsplit(params["wA2"], params["bA2"], dim_B, PB, PB)   # [PH, 2PB]
    WB2, bB2 = nsplit(params["wB2"], params["bB2"], dim_A, PA, PA)   # [PH, 2PA]
    WF2, bF2 = nsplit(params["wF2"], params["bF2"], dim_A, PA, PB)   # [PH, PA+PB]

    return dict(W1A=W1A, W1B=W1B, B1=B1, WA2=WA2, bA2=bA2, WB2=WB2, bB2=bB2,
                WF2=WF2, bF2=bF2, dims=(dim_A, dim_B, hidden), pads=(PA, PB, PH))


def _weight_bytes(prep):
    names = ("W1A", "W1B", "B1", "WA2", "bA2", "WB2", "bB2", "WF2", "bF2")
    return sum(int(prep[n].size) * jnp.dtype(prep[n].dtype).itemsize for n in names)


def _estimate_vmem_bytes(tb, PA, PB, PH, act_itemsize, weight_bytes, weight_buffers):
    act_stream = 2 * 2 * tb * (PA + PB) * act_itemsize    # in+out blocks, double-buffered
    weights = weight_buffers * weight_bytes
    live_f32 = tb * (3 * PH + 5 * (PA + PB)) * 4          # hA/hB/hF, pA2B/pB2A/zF, mods, zA/zB
    live_bf16 = tb * (2 * PH + (PA + PB)) * 2             # bf16 casts of matmul LHS
    return act_stream + weights + live_f32 + live_bf16 + (2 << 20)


def mutual_film_layer(z_A, z_B, prep, *, batch_tile=None):
    B, dim_A = z_A.shape
    B2, dim_B = z_B.shape
    assert B == B2
    assert (dim_A, dim_B) == tuple(prep["dims"][:2])
    PA, PB, PH = prep["pads"]

    # TODO(synk): callers stacking many of these layers should keep activations
    # in the lane-padded (B,PA)/(B,PB) layout across layers so this pad and the
    # output slice (one extra HBM pass each) disappear.
    zA_p = _pad2d(z_A, B, PA)
    zB_p = _pad2d(z_B, B, PB)

    # --- batch tiling --------------------------------------------------------
    if batch_tile is None:
        batch_tile = 1024                 # pipelining efficiency keeps improving to ~1024 rows
    tb = min(batch_tile, B)
    if B > 256:
        # ensure >=2 grid steps so "parallel" can shard across both TCs (v7x)
        tb = min(tb, ((B + 1) // 2 + 7) // 8 * 8)
    if tb < B:
        tb = max(8, (tb // 8) * 8)

    # --- generation-aware VMEM budget ---------------------------------------
    try:
        physical_vmem = int(pltpu.get_tpu_info().vmem_capacity_bytes)
    except Exception:
        physical_vmem = 64 << 20          # conservative (v7x-sized) fallback
    vmem_cap = int(0.70 * physical_vmem)  # ~90 MiB on 128 MiB parts, ~44 MiB on v7x

    act_itemsize = jnp.dtype(z_A.dtype).itemsize
    wbytes = _weight_bytes(prep)
    while tb > 8 and _estimate_vmem_bytes(tb, PA, PB, PH, act_itemsize, wbytes, 1) > vmem_cap:
        tb = max(8, (tb // 2 // 8) * 8)
    vmem_limit = int(min(
        max(_estimate_vmem_bytes(tb, PA, PB, PH, act_itemsize, wbytes, 2), 16 << 20),
        vmem_cap))

    grid = (pl.cdiv(B, tb),)

    def run(single_buffer_weights):
        def const_spec(shape):
            kwargs = {}
            if single_buffer_weights:
                # grid-invariant operand: single-buffer to halve its VMEM residency
                kwargs["pipeline_mode"] = pl.Buffered(1)
            return pl.BlockSpec(shape, lambda *_: (0,) * len(shape), **kwargs)

        out = pl.pallas_call(
            _mutual_film_kernel,
            out_shape=(jax.ShapeDtypeStruct((B, PA), z_A.dtype),
                       jax.ShapeDtypeStruct((B, PB), z_B.dtype)),
            grid=grid,
            in_specs=[
                pl.BlockSpec((tb, PA), lambda i: (i, 0)),
                pl.BlockSpec((tb, PB), lambda i: (i, 0)),
                const_spec((2, PA, PH)),        # wA1, wF1_A
                const_spec((2, PB, PH)),        # wB1, wF1_B
                const_spec((3, 1, PH)),         # bA1, bB1, bF1 (f32)
                const_spec((PH, 2 * PB)),       # wA2 (gamma|beta)
                const_spec((1, 2 * PB)),        # bA2
                const_spec((PH, 2 * PA)),       # wB2 (gamma|beta)
                const_spec((1, 2 * PA)),        # bB2
                const_spec((PH, PA + PB)),      # wF2 (A|B residual halves)
                const_spec((1, PA + PB)),       # bF2
            ],
            out_specs=[
                pl.BlockSpec((tb, PA), lambda i: (i, 0)),
                pl.BlockSpec((tb, PB), lambda i: (i, 0)),
            ],
            compiler_params=pltpu.CompilerParams(
                dimension_semantics=("parallel",),
                vmem_limit_bytes=vmem_limit,
            ),
        )(zA_p, zB_p, prep["W1A"], prep["W1B"], prep["B1"],
          prep["WA2"], prep["bA2"], prep["WB2"], prep["bB2"],
          prep["WF2"], prep["bF2"])
        return jax.block_until_ready(out)

    try:
        outA_p, outB_p = run(True)
    except Exception:
        # pl.Buffered(1) on constant inputs not supported on this jax/libtpu
        # combo -> fall back to default double buffering (correctness identical).
        outA_p, outB_p = run(False)

    # Strip lane padding outside the kernel.
    return outA_p[:, :dim_A], outB_p[:, :dim_B]


def reference(z_A, z_B, p):
    # Pure-JAX f32 / exact-erf reference matching the PyTorch module.
    def mlp(x, w1, b1, w2, b2):
        h = x @ w1 + b1
        h = 0.5 * h * (1.0 + jax.lax.erf(h / jnp.sqrt(2.0)))
        return h @ w2 + b2

    dim_A = z_A.shape[-1]
    dim_B = z_B.shape[-1]
    pA2B = mlp(z_A, p["wA1"], p["bA1"], p["wA2"], p["bA2"])
    g_A2B, b_A2B = pA2B[:, :dim_B], pA2B[:, dim_B:]
    zB_mod = g_A2B * z_B + b_A2B
    pB2A = mlp(z_B, p["wB1"], p["bB1"], p["wB2"], p["bB2"])
    g_B2A, b_B2A = pB2A[:, :dim_A], pB2A[:, dim_A:]
    zA_mod = g_B2A * z_A + b_B2A
    z_fused = mlp(jnp.concatenate([zA_mod, zB_mod], axis=-1),
                  p["wF1"], p["bF1"], p["wF2"], p["bF2"])
    return z_A + z_fused[:, :dim_A], z_B + z_fused[:, dim_A:]


def _init_linear(kw, kb, fan_in, fan_out):
    # matches torch.nn.Linear default init (uniform +/- 1/sqrt(fan_in)),
    # weight stored transposed as [in, out]; bias as [1, out].
    bound = 1.0 / float(fan_in) ** 0.5
    w = jax.random.uniform(kw, (fan_in, fan_out), jnp.float32, -bound, bound)
    b = jax.random.uniform(kb, (1, fan_out), jnp.float32, -bound, bound)
    return w, b


if __name__ == "__main__":
    B, dim_A, dim_B, hidden = 8, 32, 48, 64

    key = jax.random.PRNGKey(0)
    keys = jax.random.split(key, 14)

    params = {}
    # film_A2B: Linear(dim_A, hidden) -> GELU -> Linear(hidden, 2*dim_B)
    params["wA1"], params["bA1"] = _init_linear(keys[0], keys[1], dim_A, hidden)
    params["wA2"], params["bA2"] = _init_linear(keys[2], keys[3], hidden, 2 * dim_B)
    # film_B2A: Linear(dim_B, hidden) -> GELU -> Linear(hidden, 2*dim_A)
    params["wB1"], params["bB1"] = _init_linear(keys[4], keys[5], dim_B, hidden)
    params["wB2"], params["bB2"] = _init_linear(keys[6], keys[7], hidden, 2 * dim_A)
    # fuse: Linear(dim_A+dim_B, hidden) -> GELU -> Linear(hidden, dim_A+dim_B)
    params["wF1"], params["bF1"] = _init_linear(keys[8], keys[9], dim_A + dim_B, hidden)
    params["wF2"], params["bF2"] = _init_linear(keys[10], keys[11], hidden, dim_A + dim_B)

    z_A = jax.random.normal(keys[12], (B, dim_A), jnp.float32)
    z_B = jax.random.normal(keys[13], (B, dim_B), jnp.float32)

    prep = prepare_film_params(params, dim_A, dim_B, hidden)   # one-time weight prep
    outA, outB = mutual_film_layer(z_A, z_B, prep)
    jax.block_until_ready((outA, outB))

    refA, refB = reference(z_A, z_B, params)
    # bf16 MXU operands + tanh-approx GELU vs the f32/erf reference -> looser tol.
    assert jnp.allclose(outA, refA, atol=3e-2, rtol=3e-2), "z_A_new mismatch"
    assert jnp.allclose(outB, refB, atol=3e-2, rtol=3e-2), "z_B_new mismatch"

    print("KERNEL_OK")
</pallas_src>

<mosaic_0001>
module attributes {stable_mosaic.version = 11 : i64} {
  func.func @_mutual_film_kernel(%arg0: i32, %arg1: memref<8x128xf32, #tpu.memory_space<vmem>>, %arg2: memref<8x128xf32, #tpu.memory_space<vmem>>, %arg3: memref<2x128x128xbf16, #tpu.memory_space<vmem>>, %arg4: memref<2x128x128xbf16, #tpu.memory_space<vmem>>, %arg5: memref<3x1x128xf32, #tpu.memory_space<vmem>>, %arg6: memref<128x256xbf16, #tpu.memory_space<vmem>>, %arg7: memref<1x256xf32, #tpu.memory_space<vmem>>, %arg8: memref<128x256xbf16, #tpu.memory_space<vmem>>, %arg9: memref<1x256xf32, #tpu.memory_space<vmem>>, %arg10: memref<128x256xbf16, #tpu.memory_space<vmem>>, %arg11: memref<1x256xf32, #tpu.memory_space<vmem>>, %arg12: memref<8x128xf32, #tpu.memory_space<vmem>>, %arg13: memref<8x128xf32, #tpu.memory_space<vmem>>) attributes {dimension_semantics = [#tpu.dimension_semantics<parallel>], iteration_bounds = array<i64: 1>, scalar_prefetch = 0 : i64, scratch_operands = 0 : i64, tpu.core_type = #tpu.core_type<tc>, window_params = [{transform_indices = @transform_0, window_bounds = array<i64: 8, 128>}, {transform_indices = @transform_1, window_bounds = array<i64: 8, 128>}, {pipeline_mode = #tpu.pipeline_mode<synchronous>, transform_indices = @transform_2, window_bounds = array<i64: 2, 128, 128>}, {pipeline_mode = #tpu.pipeline_mode<synchronous>, transform_indices = @transform_3, window_bounds = array<i64: 2, 128, 128>}, {pipeline_mode = #tpu.pipeline_mode<synchronous>, transform_indices = @transform_4, window_bounds = array<i64: 3, 1, 128>}, {pipeline_mode = #tpu.pipeline_mode<synchronous>, transform_indices = @transform_5, window_bounds = array<i64: 128, 256>}, {pipeline_mode = #tpu.pipeline_mode<synchronous>, transform_indices = @transform_6, window_bounds = array<i64: 1, 256>}, {pipeline_mode = #tpu.pipeline_mode<synchronous>, transform_indices = @transform_7, window_bounds = array<i64: 128, 256>}, {pipeline_mode = #tpu.pipeline_mode<synchronous>, transform_indices = @transform_8, window_bounds = array<i64: 1, 256>}, {pipeline_mode = #tpu.pipeline_mode<synchronous>, transform_indices = @transform_9, window_bounds = array<i64: 128, 256>}, {pipeline_mode = #tpu.pipeline_mode<synchronous>, transform_indices = @transform_10, window_bounds = array<i64: 1, 256>}, {transform_indices = @transform_11, window_bounds = array<i64: 8, 128>}, {transform_indices = @transform_12, window_bounds = array<i64: 8, 128>}]} {
    %c0 = arith.constant 0 : index
    %c0_0 = arith.constant 0 : index
    %0 = vector.load %arg1[%c0, %c0_0] : memref<8x128xf32, #tpu.memory_space<vmem>>, vector<8x128xf32>
    %c0_1 = arith.constant 0 : index
    %c0_2 = arith.constant 0 : index
    %1 = vector.load %arg2[%c0_1, %c0_2] : memref<8x128xf32, #tpu.memory_space<vmem>>, vector<8x128xf32>
    %c0_3 = arith.constant 0 : index
    %c0_4 = arith.constant 0 : index
    %c0_5 = arith.constant 0 : index
    %2 = vector.load %arg3[%c0_3, %c0_4, %c0_5] : memref<2x128x128xbf16, #tpu.memory_space<vmem>>, vector<1x128x128xbf16>
    %3 = vector.shape_cast %2 : vector<1x128x128xbf16> to vector<128x128xbf16>
    %4 = arith.truncf %0 : vector<8x128xf32> to vector<8x128xbf16>
    %cst = arith.constant dense<0.000000e+00> : vector<8x128xf32>
    %5 = tpu.matmul %4, %3, %cst {dimension_numbers = #tpu.dot_dimension_numbers<[1], [0], [0], [1], [0, 0, 1, 1], [], []>} : vector<8x128xbf16>, vector<128x128xbf16>, vector<8x128xf32> -> vector<8x128xf32>
    %c0_6 = arith.constant 0 : index
    %c0_7 = arith.constant 0 : index
    %c0_8 = arith.constant 0 : index
    %6 = vector.load %arg5[%c0_6, %c0_7, %c0_8] : memref<3x1x128xf32, #tpu.memory_space<vmem>>, vector<1x1x128xf32>
    %7 = vector.shape_cast %6 : vector<1x1x128xf32> to vector<1x128xf32>
    %8 = vector.broadcast %7 : vector<1x128xf32> to vector<8x128xf32>
    %9 = arith.addf %5, %8 : vector<8x128xf32>
    %cst_9 = arith.constant 5.000000e-01 : f32
    %10 = vector.broadcast %cst_9 : f32 to vector<8x128xf32>
    %11 = arith.mulf %10, %9 : vector<8x128xf32>
    %cst_10 = arith.constant 4.471500e-02 : f32
    %12 = vector.broadcast %cst_10 : f32 to vector<8x128xf32>
    %13 = arith.mulf %12, %9 : vector<8x128xf32>
    %14 = arith.mulf %13, %9 : vector<8x128xf32>
    %15 = arith.mulf %14, %9 : vector<8x128xf32>
    %16 = arith.addf %9, %15 : vector<8x128xf32>
    %cst_11 = arith.constant 0.797884583 : f32
    %17 = vector.broadcast %cst_11 : f32 to vector<8x128xf32>
    %18 = arith.mulf %17, %16 : vector<8x128xf32>
    %19 = math.tanh %18 : vector<8x128xf32>
    %cst_12 = arith.constant 1.000000e+00 : f32
    %20 = vector.broadcast %cst_12 : f32 to vector<8x128xf32>
    %21 = arith.addf %20, %19 : vector<8x128xf32>
    %22 = arith.mulf %11, %21 : vector<8x128xf32>
    %c0_13 = arith.constant 0 : index
    %c0_14 = arith.constant 0 : index
    %23 = vector.load %arg6[%c0_13, %c0_14] : memref<128x256xbf16, #tpu.memory_space<vmem>>, vector<128x256xbf16>
    %24 = arith.truncf %22 : vector<8x128xf32> to vector<8x128xbf16>
    %cst_15 = arith.constant dense<0.000000e+00> : vector<8x256xf32>
    %25 = tpu.matmul %24, %23, %cst_15 {dimension_numbers = #tpu.dot_dimension_numbers<[1], [0], [0], [1], [0, 0, 1, 1], [], []>} : vector<8x128xbf16>, vector<128x256xbf16>, vector<8x256xf32> -> vector<8x256xf32>
    %c0_16 = arith.constant 0 : index
    %c0_17 = arith.constant 0 : index
    %26 = vector.load %arg7[%c0_16, %c0_17] : memref<1x256xf32, #tpu.memory_space<vmem>>, vector<1x256xf32>
    %27 = vector.broadcast %26 : vector<1x256xf32> to vector<8x256xf32>
    %28 = arith.addf %25, %27 : vector<8x256xf32>
    %29 = vector.extract_strided_slice %28 {offsets = [0, 0], sizes = [8, 128], strides = [1, 1]} : vector<8x256xf32> to vector<8x128xf32>
    %30 = arith.mulf %29, %1 : vector<8x128xf32>
    %31 = vector.extract_strided_slice %28 {offsets = [0, 128], sizes = [8, 128], strides = [1, 1]} : vector<8x256xf32> to vector<8x128xf32>
    %32 = arith.addf %30, %31 : vector<8x128xf32>
    %c0_18 = arith.constant 0 : index
    %c0_19 = arith.constant 0 : index
    %c0_20 = arith.constant 0 : index
    %33 = vector.load %arg4[%c0_18, %c0_19, %c0_20] : memref<2x128x128xbf16, #tpu.memory_space<vmem>>, vector<1x128x128xbf16>
    %34 = vector.shape_cast %33 : vector<1x128x128xbf16> to vector<128x128xbf16>
    %35 = arith.truncf %1 : vector<8x128xf32> to vector<8x128xbf16>
    %cst_21 = arith.constant dense<0.000000e+00> : vector<8x128xf32>
    %36 = tpu.matmul %35, %34, %cst_21 {dimension_numbers = #tpu.dot_dimension_numbers<[1], [0], [0], [1], [0, 0, 1, 1], [], []>} : vector<8x128xbf16>, vector<128x128xbf16>, vector<8x128xf32> -> vector<8x128xf32>
    %c1 = arith.constant 1 : index
    %c0_22 = arith.constant 0 : index
    %c0_23 = arith.constant 0 : index
    %37 = vector.load %arg5[%c1, %c0_22, %c0_23] : memref<3x1x128xf32, #tpu.memory_space<vmem>>, vector<1x1x128xf32>
    %38 = vector.shape_cast %37 : vector<1x1x128xf32> to vector<1x128xf32>
    %39 = vector.broadcast %38 : vector<1x128xf32> to vector<8x128xf32>
    %40 = arith.addf %36, %39 : vector<8x128xf32>
    %cst_24 = arith.constant 5.000000e-01 : f32
    %41 = vector.broadcast %cst_24 : f32 to vector<8x128xf32>
    %42 = arith.mulf %41, %40 : vector<8x128xf32>
    %cst_25 = arith.constant 4.471500e-02 : f32
    %43 = vector.broadcast %cst_25 : f32 to vector<8x128xf32>
    %44 = arith.mulf %43, %40 : vector<8x128xf32>
    %45 = arith.mulf %44, %40 : vector<8x128xf32>
    %46 = arith.mulf %45, %40 : vector<8x128xf32>
    %47 = arith.addf %40, %46 : vector<8x128xf32>
    %cst_26 = arith.constant 0.797884583 : f32
    %48 = vector.broadcast %cst_26 : f32 to vector<8x128xf32>
    %49 = arith.mulf %48, %47 : vector<8x128xf32>
    %50 = math.tanh %49 : vector<8x128xf32>
    %cst_27 = arith.constant 1.000000e+00 : f32
    %51 = vector.broadcast %cst_27 : f32 to vector<8x128xf32>
    %52 = arith.addf %51, %50 : vector<8x128xf32>
    %53 = arith.mulf %42, %52 : vector<8x128xf32>
    %c0_28 = arith.constant 0 : index
    %c0_29 = arith.constant 0 : index
    %54 = vector.load %arg8[%c0_28, %c0_29] : memref<128x256xbf16, #tpu.memory_space<vmem>>, vector<128x256xbf16>
    %55 = arith.truncf %53 : vector<8x128xf32> to vector<8x128xbf16>
    %cst_30 = arith.constant dense<0.000000e+00> : vector<8x256xf32>
    %56 = tpu.matmul %55, %54, %cst_30 {dimension_numbers = #tpu.dot_dimension_numbers<[1], [0], [0], [1], [0, 0, 1, 1], [], []>} : vector<8x128xbf16>, vector<128x256xbf16>, vector<8x256xf32> -> vector<8x256xf32>
    %c0_31 = arith.constant 0 : index
    %c0_32 = arith.constant 0 : index
    %57 = vector.load %arg9[%c0_31, %c0_32] : memref<1x256xf32, #tpu.memory_space<vmem>>, vector<1x256xf32>
    %58 = vector.broadcast %57 : vector<1x256xf32> to vector<8x256xf32>
    %59 = arith.addf %56, %58 : vector<8x256xf32>
    %60 = vector.extract_strided_slice %59 {offsets = [0, 0], sizes = [8, 128], strides = [1, 1]} : vector<8x256xf32> to vector<8x128xf32>
    %61 = arith.mulf %60, %0 : vector<8x128xf32>
    %62 = vector.extract_strided_slice %59 {offsets = [0, 128], sizes = [8, 128], strides = [1, 1]} : vector<8x256xf32> to vector<8x128xf32>
    %63 = arith.addf %61, %62 : vector<8x128xf32>
    %c1_33 = arith.constant 1 : index
    %c0_34 = arith.constant 0 : index
    %c0_35 = arith.constant 0 : index
    %64 = vector.load %arg3[%c1_33, %c0_34, %c0_35] : memref<2x128x128xbf16, #tpu.memory_space<vmem>>, vector<1x128x128xbf16>
    %65 = vector.shape_cast %64 : vector<1x128x128xbf16> to vector<128x128xbf16>
    %66 = arith.truncf %63 : vector<8x128xf32> to vector<8x128xbf16>
    %cst_36 = arith.constant dense<0.000000e+00> : vector<8x128xf32>
    %67 = tpu.matmul %66, %65, %cst_36 {dimension_numbers = #tpu.dot_dimension_numbers<[1], [0], [0], [1], [0, 0, 1, 1], [], []>} : vector<8x128xbf16>, vector<128x128xbf16>, vector<8x128xf32> -> vector<8x128xf32>
    %c1_37 = arith.constant 1 : index
    %c0_38 = arith.constant 0 : index
    %c0_39 = arith.constant 0 : index
    %68 = vector.load %arg4[%c1_37, %c0_38, %c0_39] : memref<2x128x128xbf16, #tpu.memory_space<vmem>>, vector<1x128x128xbf16>
    %69 = vector.shape_cast %68 : vector<1x128x128xbf16> to vector<128x128xbf16>
    %70 = arith.truncf %32 : vector<8x128xf32> to vector<8x128xbf16>
    %cst_40 = arith.constant dense<0.000000e+00> : vector<8x128xf32>
    %71 = tpu.matmul %70, %69, %cst_40 {dimension_numbers = #tpu.dot_dimension_numbers<[1], [0], [0], [1], [0, 0, 1, 1], [], []>} : vector<8x128xbf16>, vector<128x128xbf16>, vector<8x128xf32> -> vector<8x128xf32>
    %72 = arith.addf %67, %71 : vector<8x128xf32>
    %c2 = arith.constant 2 : index
    %c0_41 = arith.constant 0 : index
    %c0_42 = arith.constant 0 : index
    %73 = vector.load %arg5[%c2, %c0_41, %c0_42] : memref<3x1x128xf32, #tpu.memory_space<vmem>>, vector<1x1x128xf32>
    %74 = vector.shape_cast %73 : vector<1x1x128xf32> to vector<1x128xf32>
    %75 = vector.broadcast %74 : vector<1x128xf32> to vector<8x128xf32>
    %76 = arith.addf %72, %75 : vector<8x128xf32>
    %cst_43 = arith.constant 5.000000e-01 : f32
    %77 = vector.broadcast %cst_43 : f32 to vector<8x128xf32>
    %78 = arith.mulf %77, %76 : vector<8x128xf32>
    %cst_44 = arith.constant 4.471500e-02 : f32
    %79 = vector.broadcast %cst_44 : f32 to vector<8x128xf32>
    %80 = arith.mulf %79, %76 : vector<8x128xf32>
    %81 = arith.mulf %80, %76 : vector<8x128xf32>
    %82 = arith.mulf %81, %76 : vector<8x128xf32>
    %83 = arith.addf %76, %82 : vector<8x128xf32>
    %cst_45 = arith.constant 0.797884583 : f32
    %84 = vector.broadcast %cst_45 : f32 to vector<8x128xf32>
    %85 = arith.mulf %84, %83 : vector<8x128xf32>
    %86 = math.tanh %85 : vector<8x128xf32>
    %cst_46 = arith.constant 1.000000e+00 : f32
    %87 = vector.broadcast %cst_46 : f32 to vector<8x128xf32>
    %88 = arith.addf %87, %86 : vector<8x128xf32>
    %89 = arith.mulf %78, %88 : vector<8x128xf32>
    %c0_47 = arith.constant 0 : index
    %c0_48 = arith.constant 0 : index
    %90 = vector.load %arg10[%c0_47, %c0_48] : memref<128x256xbf16, #tpu.memory_space<vmem>>, vector<128x256xbf16>
    %91 = arith.truncf %89 : vector<8x128xf32> to vector<8x128xbf16>
    %cst_49 = arith.constant dense<0.000000e+00> : vector<8x256xf32>
    %92 = tpu.matmul %91, %90, %cst_49 {dimension_numbers = #tpu.dot_dimension_numbers<[1], [0], [0], [1], [0, 0, 1, 1], [], []>} : vector<8x128xbf16>, vector<128x256xbf16>, vector<8x256xf32> -> vector<8x256xf32>
    %c0_50 = arith.constant 0 : index
    %c0_51 = arith.constant 0 : index
    %93 = vector.load %arg11[%c0_50, %c0_51] : memref<1x256xf32, #tpu.memory_space<vmem>>, vector<1x256xf32>
    %94 = vector.broadcast %93 : vector<1x256xf32> to vector<8x256xf32>
    %95 = arith.addf %92, %94 : vector<8x256xf32>
    %96 = vector.extract_strided_slice %95 {offsets = [0, 0], sizes = [8, 128], strides = [1, 1]} : vector<8x256xf32> to vector<8x128xf32>
    %97 = arith.addf %0, %96 : vector<8x128xf32>
    %c0_52 = arith.constant 0 : index
    %c0_53 = arith.constant 0 : index
    %98 = vector.load %arg12[%c0_52, %c0_53] : memref<8x128xf32, #tpu.memory_space<vmem>>, vector<8x128xf32>
    tpu.vector_store %arg12[%c0_52, %c0_53], %97 {strides = array<i32>} : memref<8x128xf32, #tpu.memory_space<vmem>>, vector<8x128xf32>,
    %99 = vector.extract_strided_slice %95 {offsets = [0, 128], sizes = [8, 128], strides = [1, 1]} : vector<8x256xf32> to vector<8x128xf32>
    %100 = arith.addf %1, %99 : vector<8x128xf32>
    %c0_54 = arith.constant 0 : index
    %c0_55 = arith.constant 0 : index
    %101 = vector.load %arg13[%c0_54, %c0_55] : memref<8x128xf32, #tpu.memory_space<vmem>>, vector<8x128xf32>
    tpu.vector_store %arg13[%c0_54, %c0_55], %100 {strides = array<i32>} : memref<8x128xf32, #tpu.memory_space<vmem>>, vector<8x128xf32>,
    return
  }
  func.func @transform_0(%arg0: i32) -> (i32, i32) {
    %c0_i32 = arith.constant 0 : i32
    %c0_i32_0 = arith.constant 0 : i32
    return %arg0, %c0_i32 : i32, i32
  }
  func.func @transform_1(%arg0: i32) -> (i32, i32) {
    %c0_i32 = arith.constant 0 : i32
    %c0_i32_0 = arith.constant 0 : i32
    return %arg0, %c0_i32 : i32, i32
  }
  func.func @transform_2(%arg0: i32) -> (i32, i32, i32) {
    %c0_i32 = arith.constant 0 : i32
    %c0_i32_0 = arith.constant 0 : i32
    %c0_i32_1 = arith.constant 0 : i32
    %c0_i32_2 = arith.constant 0 : i32
    return %c0_i32, %c0_i32_0, %c0_i32_1 : i32, i32, i32
  }
  func.func @transform_3(%arg0: i32) -> (i32, i32, i32) {
    %c0_i32 = arith.constant 0 : i32
    %c0_i32_0 = arith.constant 0 : i32
    %c0_i32_1 = arith.constant 0 : i32
    %c0_i32_2 = arith.constant 0 : i32
    return %c0_i32, %c0_i32_0, %c0_i32_1 : i32, i32, i32
  }
  func.func @transform_4(%arg0: i32) -> (i32, i32, i32) {
    %c0_i32 = arith.constant 0 : i32
    %c0_i32_0 = arith.constant 0 : i32
    %c0_i32_1 = arith.constant 0 : i32
    %c0_i32_2 = arith.constant 0 : i32
    return %c0_i32, %c0_i32_0, %c0_i32_1 : i32, i32, i32
  }
  func.func @transform_5(%arg0: i32) -> (i32, i32) {
    %c0_i32 = arith.constant 0 : i32
    %c0_i32_0 = arith.constant 0 : i32
    %c0_i32_1 = arith.constant 0 : i32
    return %c0_i32, %c0_i32_0 : i32, i32
  }
  func.func @transform_6(%arg0: i32) -> (i32, i32) {
    %c0_i32 = arith.constant 0 : i32
    %c0_i32_0 = arith.constant 0 : i32
    %c0_i32_1 = arith.constant 0 : i32
    return %c0_i32, %c0_i32_0 : i32, i32
  }
  func.func @transform_7(%arg0: i32) -> (i32, i32) {
    %c0_i32 = arith.constant 0 : i32
    %c0_i32_0 = arith.constant 0 : i32
    %c0_i32_1 = arith.constant 0 : i32
    return %c0_i32, %c0_i32_0 : i32, i32
  }
  func.func @transform_8(%arg0: i32) -> (i32, i32) {
    %c0_i32 = arith.constant 0 : i32
    %c0_i32_0 = arith.constant 0 : i32
    %c0_i32_1 = arith.constant 0 : i32
    return %c0_i32, %c0_i32_0 : i32, i32
  }
  func.func @transform_9(%arg0: i32) -> (i32, i32) {
    %c0_i32 = arith.constant 0 : i32
    %c0_i32_0 = arith.constant 0 : i32
    %c0_i32_1 = arith.constant 0 : i32
    return %c0_i32, %c0_i32_0 : i32, i32
  }
  func.func @transform_10(%arg0: i32) -> (i32, i32) {
    %c0_i32 = arith.constant 0 : i32
    %c0_i32_0 = arith.constant 0 : i32
    %c0_i32_1 = arith.constant 0 : i32
    return %c0_i32, %c0_i32_0 : i32, i32
  }
  func.func @transform_11(%arg0: i32) -> (i32, i32) {
    %c0_i32 = arith.constant 0 : i32
    %c0_i32_0 = arith.constant 0 : i32
    return %arg0, %c0_i32 : i32, i32
  }
  func.func @transform_12(%arg0: i32) -> (i32, i32) {
    %c0_i32 = arith.constant 0 : i32
    %c0_i32_0 = arith.constant 0 : i32
    return %arg0, %c0_i32 : i32, i32
  }
}

module attributes {stable_mosaic.version = 11 : i64} {
  func.func @_mutual_film_kernel(%arg0: i32, %arg1: memref<8x128xf32, #tpu.memory_space<vmem>>, %arg2: memref<8x128xf32, #tpu.memory_space<vmem>>, %arg3: memref<2x128x128xbf16, #tpu.memory_space<vmem>>, %arg4: memref<2x128x128xbf16, #tpu.memory_space<vmem>>, %arg5: memref<3x1x128xf32, #tpu.memory_space<vmem>>, %arg6: memref<128x256xbf16, #tpu.memory_space<vmem>>, %arg7: memref<1x256xf32, #tpu.memory_space<vmem>>, %arg8: memref<128x256xbf16, #tpu.memory_space<vmem>>, %arg9: memref<1x256xf32, #tpu.memory_space<vmem>>, %arg10: memref<128x256xbf16, #tpu.memory_space<vmem>>, %arg11: memref<1x256xf32, #tpu.memory_space<vmem>>, %arg12: memref<8x128xf32, #tpu.memory_space<vmem>>, %arg13: memref<8x128xf32, #tpu.memory_space<vmem>>) attributes {dimension_semantics = [#tpu.dimension_semantics<parallel>], iteration_bounds = array<i64: 1>, scalar_prefetch = 0 : i64, scratch_operands = 0 : i64, tpu.core_type = #tpu.core_type<tc>, window_params = [{transform_indices = @transform_0, window_bounds = array<i64: 8, 128>}, {transform_indices = @transform_1, window_bounds = array<i64: 8, 128>}, {pipeline_mode = #tpu.pipeline_mode<synchronous>, transform_indices = @transform_2, window_bounds = array<i64: 2, 128, 128>}, {pipeline_mode = #tpu.pipeline_mode<synchronous>, transform_indices = @transform_3, window_bounds = array<i64: 2, 128, 128>}, {pipeline_mode = #tpu.pipeline_mode<synchronous>, transform_indices = @transform_4, window_bounds = array<i64: 3, 1, 128>}, {pipeline_mode = #tpu.pipeline_mode<synchronous>, transform_indices = @transform_5, window_bounds = array<i64: 128, 256>}, {pipeline_mode = #tpu.pipeline_mode<synchronous>, transform_indices = @transform_6, window_bounds = array<i64: 1, 256>}, {pipeline_mode = #tpu.pipeline_mode<synchronous>, transform_indices = @transform_7, window_bounds = array<i64: 128, 256>}, {pipeline_mode = #tpu.pipeline_mode<synchronous>, transform_indices = @transform_8, window_bounds = array<i64: 1, 256>}, {pipeline_mode = #tpu.pipeline_mode<synchronous>, transform_indices = @transform_9, window_bounds = array<i64: 128, 256>}, {pipeline_mode = #tpu.pipeline_mode<synchronous>, transform_indices = @transform_10, window_bounds = array<i64: 1, 256>}, {transform_indices = @transform_11, window_bounds = array<i64: 8, 128>}, {transform_indices = @transform_12, window_bounds = array<i64: 8, 128>}]} {
    %c0 = arith.constant 0 : index
    %c0_0 = arith.constant 0 : index
    %0 = vector.load %arg1[%c0, %c0_0] : memref<8x128xf32, #tpu.memory_space<vmem>>, vector<8x128xf32>
    %c0_1 = arith.constant 0 : index
    %c0_2 = arith.constant 0 : index
    %1 = vector.load %arg2[%c0_1, %c0_2] : memref<8x128xf32, #tpu.memory_space<vmem>>, vector<8x128xf32>
    %c0_3 = arith.constant 0 : index
    %c0_4 = arith.constant 0 : index
    %c0_5 = arith.constant 0 : index
    %2 = vector.load %arg3[%c0_3, %c0_4, %c0_5] : memref<2x128x128xbf16, #tpu.memory_space<vmem>>, vector<1x128x128xbf16>
    %3 = vector.shape_cast %2 : vector<1x128x128xbf16> to vector<128x128xbf16>
    %4 = arith.truncf %0 : vector<8x128xf32> to vector<8x128xbf16>
    %cst = arith.constant dense<0.000000e+00> : vector<8x128xf32>
    %5 = tpu.matmul %4, %3, %cst {dimension_numbers = #tpu.dot_dimension_numbers<[1], [0], [0], [1], [0, 0, 1, 1], [], []>} : vector<8x128xbf16>, vector<128x128xbf16>, vector<8x128xf32> -> vector<8x128xf32>
    %c0_6 = arith.constant 0 : index
    %c0_7 = arith.constant 0 : index
    %c0_8 = arith.constant 0 : index
    %6 = vector.load %arg5[%c0_6, %c0_7, %c0_8] : memref<3x1x128xf32, #tpu.memory_space<vmem>>, vector<1x1x128xf32>
    %7 = vector.shape_cast %6 : vector<1x1x128xf32> to vector<1x128xf32>
    %8 = vector.broadcast %7 : vector<1x128xf32> to vector<8x128xf32>
    %9 = arith.addf %5, %8 : vector<8x128xf32>
    %cst_9 = arith.constant 5.000000e-01 : f32
    %10 = vector.broadcast %cst_9 : f32 to vector<8x128xf32>
    %11 = arith.mulf %10, %9 : vector<8x128xf32>
    %cst_10 = arith.constant 4.471500e-02 : f32
    %12 = vector.broadcast %cst_10 : f32 to vector<8x128xf32>
    %13 = arith.mulf %12, %9 : vector<8x128xf32>
    %14 = arith.mulf %13, %9 : vector<8x128xf32>
    %15 = arith.mulf %14, %9 : vector<8x128xf32>
    %16 = arith.addf %9, %15 : vector<8x128xf32>
    %cst_11 = arith.constant 0.797884583 : f32
    %17 = vector.broadcast %cst_11 : f32 to vector<8x128xf32>
    %18 = arith.mulf %17, %16 : vector<8x128xf32>
    %19 = math.tanh %18 : vector<8x128xf32>
    %cst_12 = arith.constant 1.000000e+00 : f32
    %20 = vector.broadcast %cst_12 : f32 to vector<8x128xf32>
    %21 = arith.addf %20, %19 : vector<8x128xf32>
    %22 = arith.mulf %11, %21 : vector<8x128xf32>
    %c0_13 = arith.constant 0 : index
    %c0_14 = arith.constant 0 : index
    %23 = vector.load %arg6[%c0_13, %c0_14] : memref<128x256xbf16, #tpu.memory_space<vmem>>, vector<128x256xbf16>
    %24 = arith.truncf %22 : vector<8x128xf32> to vector<8x128xbf16>
    %cst_15 = arith.constant dense<0.000000e+00> : vector<8x256xf32>
    %25 = tpu.matmul %24, %23, %cst_15 {dimension_numbers = #tpu.dot_dimension_numbers<[1], [0], [0], [1], [0, 0, 1, 1], [], []>} : vector<8x128xbf16>, vector<128x256xbf16>, vector<8x256xf32> -> vector<8x256xf32>
    %c0_16 = arith.constant 0 : index
    %c0_17 = arith.constant 0 : index
    %26 = vector.load %arg7[%c0_16, %c0_17] : memref<1x256xf32, #tpu.memory_space<vmem>>, vector<1x256xf32>
    %27 = vector.broadcast %26 : vector<1x256xf32> to vector<8x256xf32>
    %28 = arith.addf %25, %27 : vector<8x256xf32>
    %29 = vector.extract_strided_slice %28 {offsets = [0, 0], sizes = [8, 128], strides = [1, 1]} : vector<8x256xf32> to vector<8x128xf32>
    %30 = arith.mulf %29, %1 : vector<8x128xf32>
    %31 = vector.extract_strided_slice %28 {offsets = [0, 128], sizes = [8, 128], strides = [1, 1]} : vector<8x256xf32> to vector<8x128xf32>
    %32 = arith.addf %30, %31 : vector<8x128xf32>
    %c0_18 = arith.constant 0 : index
    %c0_19 = arith.constant 0 : index
    %c0_20 = arith.constant 0 : index
    %33 = vector.load %arg4[%c0_18, %c0_19, %c0_20] : memref<2x128x128xbf16, #tpu.memory_space<vmem>>, vector<1x128x128xbf16>
    %34 = vector.shape_cast %33 : vector<1x128x128xbf16> to vector<128x128xbf16>
    %35 = arith.truncf %1 : vector<8x128xf32> to vector<8x128xbf16>
    %cst_21 = arith.constant dense<0.000000e+00> : vector<8x128xf32>
    %36 = tpu.matmul %35, %34, %cst_21 {dimension_numbers = #tpu.dot_dimension_numbers<[1], [0], [0], [1], [0, 0, 1, 1], [], []>} : vector<8x128xbf16>, vector<128x128xbf16>, vector<8x128xf32> -> vector<8x128xf32>
    %c1 = arith.constant 1 : index
    %c0_22 = arith.constant 0 : index
    %c0_23 = arith.constant 0 : index
    %37 = vector.load %arg5[%c1, %c0_22, %c0_23] : memref<3x1x128xf32, #tpu.memory_space<vmem>>, vector<1x1x128xf32>
    %38 = vector.shape_cast %37 : vector<1x1x128xf32> to vector<1x128xf32>
    %39 = vector.broadcast %38 : vector<1x128xf32> to vector<8x128xf32>
    %40 = arith.addf %36, %39 : vector<8x128xf32>
    %cst_24 = arith.constant 5.000000e-01 : f32
    %41 = vector.broadcast %cst_24 : f32 to vector<8x128xf32>
    %42 = arith.mulf %41, %40 : vector<8x128xf32>
    %cst_25 = arith.constant 4.471500e-02 : f32
    %43 = vector.broadcast %cst_25 : f32 to vector<8x128xf32>
    %44 = arith.mulf %43, %40 : vector<8x128xf32>
    %45 = arith.mulf %44, %40 : vector<8x128xf32>
    %46 = arith.mulf %45, %40 : vector<8x128xf32>
    %47 = arith.addf %40, %46 : vector<8x128xf32>
    %cst_26 = arith.constant 0.797884583 : f32
    %48 = vector.broadcast %cst_26 : f32 to vector<8x128xf32>
    %49 = arith.mulf %48, %47 : vector<8x128xf32>
    %50 = math.tanh %49 : vector<8x128xf32>
    %cst_27 = arith.constant 1.000000e+00 : f32
    %51 = vector.broadcast %cst_27 : f32 to vector<8x128xf32>
    %52 = arith.addf %51, %50 : vector<8x128xf32>
    %53 = arith.mulf %42, %52 : vector<8x128xf32>
    %c0_28 = arith.constant 0 : index
    %c0_29 = arith.constant 0 : index
    %54 = vector.load %arg8[%c0_28, %c0_29] : memref<128x256xbf16, #tpu.memory_space<vmem>>, vector<128x256xbf16>
    %55 = arith.truncf %53 : vector<8x128xf32> to vector<8x128xbf16>
    %cst_30 = arith.constant dense<0.000000e+00> : vector<8x256xf32>
    %56 = tpu.matmul %55, %54, %cst_30 {dimension_numbers = #tpu.dot_dimension_numbers<[1], [0], [0], [1], [0, 0, 1, 1], [], []>} : vector<8x128xbf16>, vector<128x256xbf16>, vector<8x256xf32> -> vector<8x256xf32>
    %c0_31 = arith.constant 0 : index
    %c0_32 = arith.constant 0 : index
    %57 = vector.load %arg9[%c0_31, %c0_32] : memref<1x256xf32, #tpu.memory_space<vmem>>, vector<1x256xf32>
    %58 = vector.broadcast %57 : vector<1x256xf32> to vector<8x256xf32>
    %59 = arith.addf %56, %58 : vector<8x256xf32>
    %60 = vector.extract_strided_slice %59 {offsets = [0, 0], sizes = [8, 128], strides = [1, 1]} : vector<8x256xf32> to vector<8x128xf32>
    %61 = arith.mulf %60, %0 : vector<8x128xf32>
    %62 = vector.extract_strided_slice %59 {offsets = [0, 128], sizes = [8, 128], strides = [1, 1]} : vector<8x256xf32> to vector<8x128xf32>
    %63 = arith.addf %61, %62 : vector<8x128xf32>
    %c1_33 = arith.constant 1 : index
    %c0_34 = arith.constant 0 : index
    %c0_35 = arith.constant 0 : index
    %64 = vector.load %arg3[%c1_33, %c0_34, %c0_35] : memref<2x128x128xbf16, #tpu.memory_space<vmem>>, vector<1x128x128xbf16>
    %65 = vector.shape_cast %64 : vector<1x128x128xbf16> to vector<128x128xbf16>
    %66 = arith.truncf %63 : vector<8x128xf32> to vector<8x128xbf16>
    %cst_36 = arith.constant dense<0.000000e+00> : vector<8x128xf32>
    %67 = tpu.matmul %66, %65, %cst_36 {dimension_numbers = #tpu.dot_dimension_numbers<[1], [0], [0], [1], [0, 0, 1, 1], [], []>} : vector<8x128xbf16>, vector<128x128xbf16>, vector<8x128xf32> -> vector<8x128xf32>
    %c1_37 = arith.constant 1 : index
    %c0_38 = arith.constant 0 : index
    %c0_39 = arith.constant 0 : index
    %68 = vector.load %arg4[%c1_37, %c0_38, %c0_39] : memref<2x128x128xbf16, #tpu.memory_space<vmem>>, vector<1x128x128xbf16>
    %69 = vector.shape_cast %68 : vector<1x128x128xbf16> to vector<128x128xbf16>
    %70 = arith.truncf %32 : vector<8x128xf32> to vector<8x128xbf16>
    %cst_40 = arith.constant dense<0.000000e+00> : vector<8x128xf32>
    %71 = tpu.matmul %70, %69, %cst_40 {dimension_numbers = #tpu.dot_dimension_numbers<[1], [0], [0], [1], [0, 0, 1, 1], [], []>} : vector<8x128xbf16>, vector<128x128xbf16>, vector<8x128xf32> -> vector<8x128xf32>
    %72 = arith.addf %67, %71 : vector<8x128xf32>
    %c2 = arith.constant 2 : index
    %c0_41 = arith.constant 0 : index
    %c0_42 = arith.constant 0 : index
    %73 = vector.load %arg5[%c2, %c0_41, %c0_42] : memref<3x1x128xf32, #tpu.memory_space<vmem>>, vector<1x1x128xf32>
    %74 = vector.shape_cast %73 : vector<1x1x128xf32> to vector<1x128xf32>
    %75 = vector.broadcast %74 : vector<1x128xf32> to vector<8x128xf32>
    %76 = arith.addf %72, %75 : vector<8x128xf32>
    %cst_43 = arith.constant 5.000000e-01 : f32
    %77 = vector.broadcast %cst_43 : f32 to vector<8x128xf32>
    %78 = arith.mulf %77, %76 : vector<8x128xf32>
    %cst_44 = arith.constant 4.471500e-02 : f32
    %79 = vector.broadcast %cst_44 : f32 to vector<8x128xf32>
    %80 = arith.mulf %79, %76 : vector<8x128xf32>
    %81 = arith.mulf %80, %76 : vector<8x128xf32>
    %82 = arith.mulf %81, %76 : vector<8x128xf32>
    %83 = arith.addf %76, %82 : vector<8x128xf32>
    %cst_45 = arith.constant 0.797884583 : f32
    %84 = vector.broadcast %cst_45 : f32 to vector<8x128xf32>
    %85 = arith.mulf %84, %83 : vector<8x128xf32>
    %86 = math.tanh %85 : vector<8x128xf32>
    %cst_46 = arith.constant 1.000000e+00 : f32
    %87 = vector.broadcast %cst_46 : f32 to vector<8x128xf32>
    %88 = arith.addf %87, %86 : vector<8x128xf32>
    %89 = arith.mulf %78, %88 : vector<8x128xf32>
    %c0_47 = arith.constant 0 : index
    %c0_48 = arith.constant 0 : index
    %90 = vector.load %arg10[%c0_47, %c0_48] : memref<128x256xbf16, #tpu.memory_space<vmem>>, vector<128x256xbf16>
    %91 = arith.truncf %89 : vector<8x128xf32> to vector<8x128xbf16>
    %cst_49 = arith.constant dense<0.000000e+00> : vector<8x256xf32>
    %92 = tpu.matmul %91, %90, %cst_49 {dimension_numbers = #tpu.dot_dimension_numbers<[1], [0], [0], [1], [0, 0, 1, 1], [], []>} : vector<8x128xbf16>, vector<128x256xbf16>, vector<8x256xf32> -> vector<8x256xf32>
    %c0_50 = arith.constant 0 : index
    %c0_51 = arith.constant 0 : index
    %93 = vector.load %arg11[%c0_50, %c0_51] : memref<1x256xf32, #tpu.memory_space<vmem>>, vector<1x256xf32>
    %94 = vector.broadcast %93 : vector<1x256xf32> to vector<8x256xf32>
    %95 = arith.addf %92, %94 : vector<8x256xf32>
    %96 = vector.extract_strided_slice %95 {offsets = [0, 0], sizes = [8, 128], strides = [1, 1]} : vector<8x256xf32> to vector<8x128xf32>
    %97 = arith.addf %0, %96 : vector<8x128xf32>
    %c0_52 = arith.constant 0 : index
    %c0_53 = arith.constant 0 : index
    %98 = vector.load %arg12[%c0_52, %c0_53] : memref<8x128xf32, #tpu.memory_space<vmem>>, vector<8x128xf32>
    tpu.vector_store %arg12[%c0_52, %c0_53], %97 {strides = array<i32>} : memref<8x128xf32, #tpu.memory_space<vmem>>, vector<8x128xf32>,
    %99 = vector.extract_strided_slice %95 {offsets = [0, 128], sizes = [8, 128], strides = [1, 1]} : vector<8x256xf32> to vector<8x128xf32>
    %100 = arith.addf %1, %99 : vector<8x128xf32>
    %c0_54 = arith.constant 0 : index
    %c0_55 = arith.constant 0 : index
    %101 = vector.load %arg13[%c0_54, %c0_55] : memref<8x128xf32, #tpu.memory_space<vmem>>, vector<8x128xf32>
    tpu.vector_store %arg13[%c0_54, %c0_55], %100 {strides = array<i32>} : memref<8x128xf32, #tpu.memory_space<vmem>>, vector<8x128xf32>,
    return
  }
  func.func @transform_0(%arg0: i32) -> (i32, i32) {
    %c0_i32 = arith.constant 0 : i32
    %c0_i32_0 = arith.constant 0 : i32
    return %arg0, %c0_i32 : i32, i32
  }
  func.func @transform_1(%arg0: i32) -> (i32, i32) {
    %c0_i32 = arith.constant 0 : i32
    %c0_i32_0 = arith.constant 0 : i32
    return %arg0, %c0_i32 : i32, i32
  }
  func.func @transform_2(%arg0: i32) -> (i32, i32, i32) {
    %c0_i32 = arith.constant 0 : i32
    %c0_i32_0 = arith.constant 0 : i32
    %c0_i32_1 = arith.constant 0 : i32
    %c0_i32_2 = arith.constant 0 : i32
    return %c0_i32, %c0_i32_0, %c0_i32_1 : i32, i32, i32
  }
  func.func @transform_3(%arg0: i32) -> (i32, i32, i32) {
    %c0_i32 = arith.constant 0 : i32
    %c0_i32_0 = arith.constant 0 : i32
    %c0_i32_1 = arith.constant 0 : i32
    %c0_i32_2 = arith.constant 0 : i32
    return %c0_i32, %c0_i32_0, %c0_i32_1 : i32, i32, i32
  }
  func.func @transform_4(%arg0: i32) -> (i32, i32, i32) {
    %c0_i32 = arith.constant 0 : i32
    %c0_i32_0 = arith.constant 0 : i32
    %c0_i32_1 = arith.constant 0 : i32
    %c0_i32_2 = arith.constant 0 : i32
    return %c0_i32, %c0_i32_0, %c0_i32_1 : i32, i32, i32
  }
  func.func @transform_5(%arg0: i32) -> (i32, i32) {
    %c0_i32 = arith.constant 0 : i32
    %c0_i32_0 = arith.constant 0 : i32
    %c0_i32_1 = arith.constant 0 : i32
    return %c0_i32, %c0_i32_0 : i32, i32
  }
  func.func @transform_6(%arg0: i32) -> (i32, i32) {
    %c0_i32 = arith.constant 0 : i32
    %c0_i32_0 = arith.constant 0 : i32
    %c0_i32_1 = arith.constant 0 : i32
    return %c0_i32, %c0_i32_0 : i32, i32
  }
  func.func @transform_7(%arg0: i32) -> (i32, i32) {
    %c0_i32 = arith.constant 0 : i32
    %c0_i32_0 = arith.constant 0 : i32
    %c0_i32_1 = arith.constant 0 : i32
    return %c0_i32, %c0_i32_0 : i32, i32
  }
  func.func @transform_8(%arg0: i32) -> (i32, i32) {
    %c0_i32 = arith.constant 0 : i32
    %c0_i32_0 = arith.constant 0 : i32
    %c0_i32_1 = arith.constant 0 : i32
    return %c0_i32, %c0_i32_0 : i32, i32
  }
  func.func @transform_9(%arg0: i32) -> (i32, i32) {
    %c0_i32 = arith.constant 0 : i32
    %c0_i32_0 = arith.constant 0 : i32
    %c0_i32_1 = arith.constant 0 : i32
    return %c0_i32, %c0_i32_0 : i32, i32
  }
  func.func @transform_10(%arg0: i32) -> (i32, i32) {
    %c0_i32 = arith.constant 0 : i32
    %c0_i32_0 = arith.constant 0 : i32
    %c0_i32_1 = arith.constant 0 : i32
    return %c0_i32, %c0_i32_0 : i32, i32
  }
  func.func @transform_11(%arg0: i32) -> (i32, i32) {
    %c0_i32 = arith.constant 0 : i32
    %c0_i32_0 = arith.constant 0 : i32
    return %arg0, %c0_i32 : i32, i32
  }
  func.func @transform_12(%arg0: i32) -> (i32, i32) {
    %c0_i32 = arith.constant 0 : i32
    %c0_i32_0 = arith.constant 0 : i32
    return %arg0, %c0_i32 : i32, i32
  }
}

</mosaic_0001>

<bundles_post_ra>
// kernel: tpu_custom_call.1
= control target key start
LH: loop header
LB: loop body
LE: loop exit
PB: predicated region body
PF: predicated region fallthrough
CT: control target
= control target key end

     0   :  { %18 = vsyncpa [#allocation3], 0  ;;  %s1930_s0 = inlined_call_operand.hbm [shape: f32[8,128], index: 0, kind: input, shape index: {}]   ;;  %s1931_s1 = inlined_call_operand.hbm [shape: f32[8,128], index: 1, kind: input, shape index: {}]   ;;  %s1932_s2 = inlined_call_operand.hbm [shape: bf16[2,128,128], index: 2, kind: input, shape index: {}]   ;;  %s1933_s3 = inlined_call_operand.hbm [shape: bf16[2,128,128], index: 3, kind: input, shape index: {}]   ;;  %s1934_s4 = inlined_call_operand.vmem [shape: f32[3,1,128], index: 4, kind: input, shape index: {}]   ;;  %s1935_s5 = inlined_call_operand.hbm [shape: bf16[128,256], index: 5, kind: input, shape index: {}]   ;;  %s1936_s6 = inlined_call_operand.vmem [shape: f32[1,256], index: 6, kind: input, shape index: {}]   ;;  %s1937_s7 = inlined_call_operand.hbm [shape: bf16[128,256], index: 7, kind: input, shape index: {}]   ;;  %s1938_s8 = inlined_call_operand.vmem [shape: f32[1,256], index: 8, kind: input, shape index: {}]   ;;  %s1939_s9 = inlined_call_operand.hbm [shape: bf16[128,256], index: 9, kind: input, shape index: {}]   ;;  %s1940_s10 = inlined_call_operand.vmem [shape: f32[1,256], index: 10, kind: input, shape index: {}]   ;;  %s1941_s11 = inlined_call_operand.hbm [shape: f32[8,128], index: 11, kind: output, shape index: {0}]   ;;  %s1942_s12 = inlined_call_operand.hbm [shape: f32[8,128], index: 12, kind: output, shape index: {1}]  }
   0x1   :  { %19 = vsyncpa [#allocation6], 0 }
   0x2   :  { %20 = vsyncpa [#allocation9], 0 }
   0x3   :  { %21 = vsyncpa [#allocation12], 0 }
   0x4   :  { %22 = vsyncpa [#allocation4], 0 }
   0x5   :  { %23 = vsyncpa [#allocation16], 0  ;;  %s1636_s21 = smov [#allocation5]   ;;  %s1426_s25 = scalar_lea.hbm %s1931_s1, 128 }
   0x6   :  { %s40_s22 = sshll.u32 %s1636_s21, 4  ;;  %p1427_p0 = scmp.ne.s32.totalorder %s1931_s1, %s1426_s25  ;;  %s41_s22 = int_to_ptr.vmem [resolvable:$true] %s40_s22 }
   0x7   :  { %p1430_p1 = scmp.lt.u32.totalorder %s1426_s25, %s1931_s1 }
   0x9   :  { %p1432_p2 = pnand %p1430_p1, %p1427_p0 }
   0xb   :  { %1435 = shalt.err (!%p1432_p2)
}
   0xc   :  { %s1436_s30 = scalar_lea.vmem %s41_s22, 128  ;;  %p1441_p4 = scmp.lt.s32.totalorder %s41_s22, %s41_s22 }
   0xd   :  { %p1437_p3 = scmp.ne.s32.totalorder %s41_s22, %s1436_s30  ;;  %p1442_p5 = scmp.lt.s32.totalorder %s1436_s30, %s1436_s30 }
   0xf   :  { %p1443_p6 = por %p1442_p5, %p1441_p4 }
  0x11   :  { %p1444_p7 = pnand %p1443_p6, %p1437_p3 }
  0x13   :  { %1447 = shalt.err (!%p1444_p7)
}
  0x14   :  { %43 = dma.hbm_to_vmem [thread:$0]  %s1931_s1, 128, %s41_s22, [#allocation6]  }
  0x15   :  { %s1637_s15 = smov [#allocation8]   ;;  %s1448_s19 = scalar_lea.hbm %s1933_s3, 2048 }
  0x16   :  { %s61_s16 = sshll.u32 %s1637_s15, 4  ;;  %p1449_p8 = scmp.ne.s32.totalorder %s1933_s3, %s1448_s19  ;;  %s62_s16 = int_to_ptr.vmem [resolvable:$true] %s61_s16 }
  0x17   :  { %p1452_p9 = scmp.lt.u32.totalorder %s1448_s19, %s1933_s3 }
  0x19   :  { %p1454_p10 = pnand %p1452_p9, %p1449_p8 }
  0x1b   :  { %1457 = shalt.err (!%p1454_p10)
}
  0x1c   :  { %s1458_s25 = scalar_lea.vmem %s62_s16, 2048  ;;  %p1463_p12 = scmp.lt.s32.totalorder %s62_s16, %s62_s16 }
  0x1d   :  { %p1459_p11 = scmp.ne.s32.totalorder %s62_s16, %s1458_s25  ;;  %p1464_p13 = scmp.lt.s32.totalorder %s1458_s25, %s1458_s25 }
  0x1f   :  { %p1465_p0 = por %p1464_p13, %p1463_p12 }
  0x21   :  { %p1466_p1 = pnand %p1465_p0, %p1459_p11 }
  0x23   :  { %1469 = shalt.err (!%p1466_p1)
}
  0x24   :  { %s1638_s1 = smov 64   ;;  %s1639_s22 = smov 4  }
  0x25   :  { %67 = dma.hbm_to_vmem [thread:$0]  %s1933_s3, 2048, %s62_s16, [#allocation9], %s1638_s1, %s1638_s1, %s1639_s22  }
  0x26   :  { %s1640_s28 = smov [#allocation11]   ;;  %s1641_s30 = smov [#allocation2]  }
  0x27   :  { %s89_s29 = sshll.u32 %s1640_s28, 4  ;;  %s30_s13 = sshll.u32 %s1641_s30, 4  ;;  %s90_s29 = int_to_ptr.vmem [resolvable:$true] %s89_s29  ;;  %s31_s13 = int_to_ptr.vmem [resolvable:$true] %s30_s13 }
  0x28   :  { %s1470_s17 = scalar_lea.hbm %s1937_s7, 2048 }
  0x29   :  { %p1471_p2 = scmp.ne.s32.totalorder %s1937_s7, %s1470_s17  ;;  %p1474_p3 = scmp.lt.u32.totalorder %s1470_s17, %s1937_s7 }
  0x2b   :  { %p1476_p4 = pnand %p1474_p3, %p1471_p2 }
  0x2d   :  { %1479 = shalt.err (!%p1476_p4)
}
  0x2e   :  { %s1480_s3 = scalar_lea.vmem %s90_s29, 2048  ;;  %p1485_p6 = scmp.lt.s32.totalorder %s90_s29, %s90_s29 }
  0x2f   :  { %p1481_p5 = scmp.ne.s32.totalorder %s90_s29, %s1480_s3  ;;  %p1486_p7 = scmp.lt.s32.totalorder %s1480_s3, %s1480_s3 }
  0x31   :  { %p1487_p8 = por %p1486_p7, %p1485_p6 }
  0x33   :  { %p1488_p9 = pnand %p1487_p8, %p1481_p5 }
  0x35   :  { %1491 = shalt.err (!%p1488_p9)
}
  0x36   :  { %s1642_s16 = smov 128   ;;  %s1643_s23 = smov 8  }
  0x37   :  { %95 = dma.hbm_to_vmem [thread:$0]  %s1937_s7, 2048, %s90_s29, [#allocation12], %s1642_s16, %s1642_s16, %s1643_s23  }
  0x38   :  { %s1492_s28 = scalar_lea.hbm %s1930_s0, 128 }
  0x39   :  { %p1493_p10 = scmp.ne.s32.totalorder %s1930_s0, %s1492_s28  ;;  %p1496_p11 = scmp.lt.u32.totalorder %s1492_s28, %s1930_s0 }
  0x3b   :  { %p1498_p12 = pnand %p1496_p11, %p1493_p10 }
  0x3d   :  { %1501 = shalt.err (!%p1498_p12)
}
  0x3e   :  { %s1502_s18 = scalar_lea.vmem %s31_s13, 128  ;;  %p1507_p0 = scmp.lt.s32.totalorder %s31_s13, %s31_s13 }
  0x3f   :  { %p1503_p13 = scmp.ne.s32.totalorder %s31_s13, %s1502_s18  ;;  %p1508_p1 = scmp.lt.s32.totalorder %s1502_s18, %s1502_s18 }
  0x41   :  { %p1509_p2 = por %p1508_p1, %p1507_p0 }
  0x43   :  { %p1510_p3 = pnand %p1509_p2, %p1503_p13 }
  0x45   :  { %1513 = shalt.err (!%p1510_p3)
}
  0x46   :  { %33 = dma.hbm_to_vmem [thread:$0]  %s1930_s0, 128, %s31_s13, [#allocation3]  }
  0x47   :  { %s1644_s19 = smov [#allocation7]   ;;  %s1645_s21 = smov [#allocation10]  }
  0x48   :  { %s49_s20 = sshll.u32 %s1644_s19, 4  ;;  %s75_s3 = sshll.u32 %s1645_s21, 4  ;;  %s50_s20 = int_to_ptr.vmem [resolvable:$true] %s49_s20  ;;  %s1771_s3 = int_to_ptr.vmem [resolvable:$true] %s75_s3 }
  0x49   :  { %s1514_s26 = scalar_lea.hbm %s1932_s2, 2048 }
  0x4a   :  { %p1515_p4 = scmp.ne.s32.totalorder %s1932_s2, %s1514_s26  ;;  %p1518_p5 = scmp.lt.u32.totalorder %s1514_s26, %s1932_s2 }
  0x4c   :  { %p1520_p6 = pnand %p1518_p5, %p1515_p4 }
  0x4e   :  { %1523 = shalt.err (!%p1520_p6)
}
  0x4f   :  { %s1524_s0 = scalar_lea.vmem %s50_s20, 2048  ;;  %p1529_p8 = scmp.lt.s32.totalorder %s50_s20, %s50_s20 }
  0x50   :  { %p1525_p7 = scmp.ne.s32.totalorder %s50_s20, %s1524_s0  ;;  %p1530_p9 = scmp.lt.s32.totalorder %s1524_s0, %s1524_s0 }
  0x52   :  { %p1531_p10 = por %p1530_p9, %p1529_p8 }
  0x54   :  { %p1532_p11 = pnand %p1531_p10, %p1525_p7 }
  0x56   :  { %1535 = shalt.err (!%p1532_p11)
}
  0x57   :  { %55 = dma.hbm_to_vmem [thread:$0]  %s1932_s2, 2048, %s50_s20, [#allocation6], %s1638_s1, %s1638_s1, %s1639_s22  }
  0x58   :  { %s1536_s7 = scalar_lea.hbm %s1935_s5, 2048 }
  0x59   :  { %p1537_p12 = scmp.ne.s32.totalorder %s1935_s5, %s1536_s7  ;;  %p1540_p13 = scmp.lt.u32.totalorder %s1536_s7, %s1935_s5 }
  0x5b   :  { %p1542_p0 = pnand %p1540_p13, %p1537_p12 }
  0x5d   :  { %1545 = shalt.err (!%p1542_p0)
}
  0x5e   :  { %s1546_s25 = scalar_lea.vmem %s1771_s3, 2048  ;;  %p1551_p2 = scmp.lt.s32.totalorder %s1771_s3, %s1771_s3 }
  0x5f   :  { %p1547_p1 = scmp.ne.s32.totalorder %s1771_s3, %s1546_s25  ;;  %p1552_p3 = scmp.lt.s32.totalorder %s1546_s25, %s1546_s25 }
  0x61   :  { %p1553_p4 = por %p1552_p3, %p1551_p2 }
  0x63   :  { %p1554_p5 = pnand %p1553_p4, %p1547_p1 }
  0x65   :  { %1557 = shalt.err (!%p1554_p5)
}
  0x66   :  { %81 = dma.hbm_to_vmem [thread:$0]  %s1935_s5, 2048, %s1771_s3, [#allocation9], %s1642_s16, %s1642_s16, %s1643_s23  }
  0x67   :  { %s1646_s22 = smov [#allocation13]   ;;  %s1558_s28 = scalar_lea.hbm %s1939_s9, 2048 }
  0x68   :  { %s103_s20 = sshll.u32 %s1646_s22, 4  ;;  %p1559_p6 = scmp.ne.s32.totalorder %s1939_s9, %s1558_s28  ;;  %s104_s20 = int_to_ptr.vmem [resolvable:$true] %s103_s20 }
  0x69   :  { %p1562_p7 = scmp.lt.u32.totalorder %s1558_s28, %s1939_s9 }
  0x6b   :  { %p1564_p8 = pnand %p1562_p7, %p1559_p6 }
  0x6d   :  { %1567 = shalt.err (!%p1564_p8)
}
  0x6e   :  { %s1568_s15 = scalar_lea.vmem %s104_s20, 2048  ;;  %p1573_p10 = scmp.lt.s32.totalorder %s104_s20, %s104_s20 }
  0x6f   :  { %p1569_p9 = scmp.ne.s32.totalorder %s104_s20, %s1568_s15  ;;  %p1574_p11 = scmp.lt.s32.totalorder %s1568_s15, %s1568_s15 }
  0x71   :  { %p1575_p12 = por %p1574_p11, %p1573_p10 }
  0x73   :  { %p1576_p13 = pnand %p1575_p12, %p1569_p9 }
  0x75   :  { %1579 = shalt.err (!%p1576_p13)
}
  0x76   :  { %109 = dma.hbm_to_vmem [thread:$0]  %s1939_s9, 2048, %s104_s20, [#allocation12], %s1642_s16, %s1642_s16, %s1643_s23  }
  0x77   :  { %1624 = dma.done.wait [#allocation3], 128  }
  0x78   :  { %1625 = vsyncadd [#allocation3], 4294967168 }
  0x79   :  { %1626 = dma.done.wait [#allocation6], 2176  }
  0x7a   :  { %1627 = vsyncadd [#allocation6], 4294965120 }
  0x7b   :  { %1628 = dma.done.wait [#allocation9], 4096  }
  0x7c   :  { %1629 = vsyncadd [#allocation9], 4294963200 }
  0x7d   :  { %1630 = dma.done.wait [#allocation12], 4096  }
  0x7e   :  { %1631 = vsyncadd [#allocation12], 4294963200  ;;  %v1647_v0 = vmov 0.0   ;;  %vm1648_vm0 = vmmov 0   ;;  %v1316_v1 = vld [vmem:[#allocation7] sm:$0xff]   ;;  %v1317_v2 = vld [vmem:[#allocation7 + $0x8] sm:$0xff]  }
  0x7f   :  { %1220 = vmatprep.subr.bf16.mxu0 %v1647_v0  ;;  %1236 = vmatprep.mubr.msk.bf16.mxu0 %vm1648_vm0, %v1647_v0  ;;  %v1318_v3 = vld [vmem:[#allocation7 + $0x10] sm:$0xff]   ;;  %v1319_v4 = vld [vmem:[#allocation7 + $0x18] sm:$0xff]   ;;  %v1320_v5 = vld [vmem:[#allocation7 + $0x20] sm:$0xff]   ;;  %v1649_v30 = vmov 0   ;;  %s1651_s2 = smov [#allocation15]  }
  0x80   :  { %1221 = vmatpush3.bf16.msra.mxu0 %v1316_v1  ;;  %v1332_v6 = vld [vmem:[#allocation10 + $0x4] ss:$8 sps:$4 sm:$0xff]   ;;  %v1334_v7 = vld [vmem:[#allocation10] ss:$8 sps:$4 sm:$0xff]   ;;  %v1322_v9 = vld [vmem:[#allocation7 + $0x30] sm:$0xff]   ;;  %398 = vmatprep.mubr.bf16.mxu1 %v1649_v30  ;;  %s1083_s1 = sshll.u32 %s1651_s2, 4  ;;  %s1084_s1 = int_to_ptr.vmem [resolvable:$true] %s1083_s1 }
  0x81   :  { %1222 = vmatprep.subr.bf16.mxu0 %v1647_v0  ;;  %v1321_v8 = vld [vmem:[#allocation7 + $0x28] sm:$0xff]   ;;  %366 = vmatprep.subr.bf16.mxu1 %v1332_v6  ;;  %v1323_v10 = vld [vmem:[#allocation7 + $0x38] sm:$0xff]   ;;  %v1832_v11 = vld [vmem:[#allocation2] sm:$0xff] }
  0x82   :  { %367 = vmatpush1.bf16.msra.mxu1 %v1334_v7  ;;  %v1324_v12 = vld [vmem:[#allocation8] sm:$0xff]   ;;  %v152_v13 = vpack.c.bf16 %v1832_v11, %v1832_v11  ;;  %v1325_v14 = vld [vmem:[#allocation8 + $0x8] sm:$0xff]   ;;  %v1326_v15 = vld [vmem:[#allocation8 + $0x10] sm:$0xff]  }
  0x83   :  { %v1327_v16 = vld [vmem:[#allocation8 + $0x18] sm:$0xff]   ;;  %v1328_v17 = vld [vmem:[#allocation8 + $0x20] sm:$0xff]   ;;  %v1329_v18 = vld [vmem:[#allocation8 + $0x28] sm:$0xff]  }
  0x84   :  { %1223 = vmatpush3.bf16.msra.mxu0 %v1317_v2  ;;  %v1330_v19 = vld [vmem:[#allocation8 + $0x30] sm:$0xff]   ;;  %v1331_v20 = vld [vmem:[#allocation8 + $0x38] sm:$0xff]   ;;  %v1338_v25 = vld [vmem:[#allocation10 + $0x24] ss:$8 sps:$4 sm:$0xff]  }
  0x85   :  { %1224 = vmatprep.subr.bf16.mxu0 %v1647_v0  ;;  %v1846_v21 = vld [vmem:[#allocation5] sm:$0xff]  ;;  %v1340_v26 = vld [vmem:[#allocation10 + $0x20] ss:$8 sps:$4 sm:$0xff]   ;;  %v1344_v29 = vld [vmem:[#allocation10 + $0x44] ss:$8 sps:$4 sm:$0xff]  }
  0x86   :  { %v425_v22 = vpack.c.bf16 %v1846_v21, %v1846_v21  ;;  %v1335_v23 = vld [vmem:[#allocation10 + $0x14] ss:$8 sps:$4 sm:$0xff]   ;;  %v1337_v24 = vld [vmem:[#allocation10 + $0x10] ss:$8 sps:$4 sm:$0xff]   ;;  %v1346_v31 = vld [vmem:[#allocation10 + $0x40] ss:$8 sps:$4 sm:$0xff]  }
  0x87   :  { %368 = vmatprep.subr.bf16.mxu1 %v1335_v23  ;;  %v1341_v27 = vld [vmem:[#allocation10 + $0x34] ss:$8 sps:$4 sm:$0xff]   ;;  %v1343_v28 = vld [vmem:[#allocation10 + $0x30] ss:$8 sps:$4 sm:$0xff]   ;;  %v1350_v34 = vld [vmem:[#allocation10 + $0x64] ss:$8 sps:$4 sm:$0xff]  }
  0x88   :  { %1225 = vmatpush3.bf16.msra.mxu0 %v1318_v3  ;;  %369 = vmatpush1.bf16.msra.mxu1 %v1337_v24  ;;  %v1347_v32 = vld [vmem:[#allocation10 + $0x54] ss:$8 sps:$4 sm:$0xff]   ;;  %v1349_v33 = vld [vmem:[#allocation10 + $0x50] ss:$8 sps:$4 sm:$0xff]   ;;  %v1352_v35 = vld [vmem:[#allocation10 + $0x60] ss:$8 sps:$4 sm:$0xff]  }
  0x89   :  { %1226 = vmatprep.subr.bf16.mxu0 %v1647_v0  ;;  %370 = vmatprep.subr.bf16.mxu1 %v1338_v25  ;;  %v1353_v36 = vld [vmem:[#allocation10 + $0x74] ss:$8 sps:$4 sm:$0xff]   ;;  %v1355_v37 = vld [vmem:[#allocation10 + $0x70] ss:$8 sps:$4 sm:$0xff]   ;;  %v1358_v38 = vld [vmem:[#allocation11 + $0x4] ss:$8 sps:$4 sm:$0xff]  }
  0x8a   :  { %v1380_v39 = vld [vmem:[#allocation8 + $0x40] sm:$0xff]   ;;  %v1381_v40 = vld [vmem:[#allocation8 + $0x48] sm:$0xff]   ;;  %v1382_v41 = vld [vmem:[#allocation8 + $0x50] sm:$0xff]  }
  0x8b   :  { %v1383_v42 = vld [vmem:[#allocation8 + $0x58] sm:$0xff]   ;;  %v1384_v43 = vld [vmem:[#allocation8 + $0x60] sm:$0xff]   ;;  %v1385_v44 = vld [vmem:[#allocation8 + $0x68] sm:$0xff]  }
  0x8c   :  { %1227 = vmatpush3.bf16.msra.mxu0 %v1319_v4  ;;  %371 = vmatpush1.bf16.msra.mxu1 %v1340_v26  ;;  %v1099_v45 = vld [vmem:[%s1934_s4] ss:$0 sm:$0xff]  ;;  %v1356_v60 = vld [vmem:[#allocation11] ss:$8 sps:$4 sm:$0xff]   ;;  %v1361_v62 = vld [vmem:[#allocation11 + $0x14] ss:$8 sps:$4 sm:$0xff]  }
  0x8d   :  { %1228 = vmatprep.subr.bf16.mxu0 %v1647_v0  ;;  %372 = vmatprep.subr.bf16.mxu1 %v1341_v27  ;;  %v1125_v63 = vld [vmem:[%s1934_s4 + $0x1] ss:$0 sm:$0xff]  ;;  %v1364_v3 = vld [vmem:[#allocation11 + $0x24] ss:$8 sps:$4 sm:$0xff]   ;;  %v1374_v23 = vld [vmem:[#allocation11 + $0x60] ss:$8 sps:$4 sm:$0xff]  }
  0x8e   :  { %v1359_v1 = vld [vmem:[#allocation11 + $0x10] ss:$8 sps:$4 sm:$0xff]   ;;  %v1379_v24 = vld [vmem:[#allocation11 + $0x74] ss:$8 sps:$4 sm:$0xff]  }
  0x8f   :  { %v1377_v26 = vld [vmem:[#allocation11 + $0x70] ss:$8 sps:$4 sm:$0xff]  }
  0x90   :  { %1229 = vmatpush3.bf16.msra.mxu0 %v1320_v5  ;;  %373 = vmatpush1.bf16.msra.mxu1 %v1343_v28 }
  0x91   :  { %1230 = vmatprep.subr.bf16.mxu0 %v1647_v0  ;;  %374 = vmatprep.subr.bf16.mxu1 %v1344_v29 }
  0x94   :  { %1231 = vmatpush3.bf16.msra.mxu0 %v1321_v8  ;;  %375 = vmatpush1.bf16.msra.mxu1 %v1346_v31 }
  0x95   :  { %1232 = vmatprep.subr.bf16.mxu0 %v1647_v0  ;;  %376 = vmatprep.subr.bf16.mxu1 %v1347_v32  ;;  %v1386_v32 = vld [vmem:[#allocation8 + $0x70] sm:$0xff]  }
  0x98   :  { %1233 = vmatpush3.bf16.msra.mxu0 %v1322_v9  ;;  %377 = vmatpush1.bf16.msra.mxu1 %v1349_v33  ;;  %v1362_v9 = vld [vmem:[#allocation11 + $0x20] ss:$8 sps:$4 sm:$0xff]   ;;  %v1387_v33 = vld [vmem:[#allocation8 + $0x78] sm:$0xff]  }
  0x99   :  { %1234 = vmatprep.subr.bf16.mxu0 %v1647_v0  ;;  %378 = vmatprep.subr.bf16.mxu1 %v1350_v34  ;;  %v1388_v34 = vld [vmem:[#allocation7 + $0x40] sm:$0xff]  }
  0x9c   :  { %1235 = vmatpush3.bf16.msra.mxu0 %v1323_v10  ;;  %379 = vmatpush1.bf16.msra.mxu1 %v1352_v35  ;;  %v1367_v10 = vld [vmem:[#allocation11 + $0x34] ss:$8 sps:$4 sm:$0xff]   ;;  %v1389_v35 = vld [vmem:[#allocation7 + $0x48] sm:$0xff]  }
  0x9d   :  { %1240 = vmatprep.subr.bf16.mxu0 %v1647_v0  ;;  %380 = vmatprep.subr.bf16.mxu1 %v1353_v36  ;;  %v1390_v36 = vld [vmem:[#allocation7 + $0x50] sm:$0xff]  }
  0x9f   :  { %1237 = vmatmul.mubr.bf16.vlgmr.msra.gmra.mrb[0].mxu0 %v152_v13 }
  0xa0   :  { %1241 = vmatpush3.bf16.msra.mxu0 %v1324_v12  ;;  %1256 = vmatprep.mubr.msk.bf16.mxu0 %vm1648_vm0, %v1647_v0 }
  0xa1   :  { %1242 = vmatprep.subr.bf16.mxu0 %v1647_v0  ;;  %381 = vmatpush1.bf16.msra.mxu1 %v1355_v37  ;;  %v1391_v37 = vld [vmem:[#allocation7 + $0x58] sm:$0xff]  }
  0xa2   :  { %640 = vmatprep.subr.bf16.mxu1 %v1358_v38  ;;  %v1392_v38 = vld [vmem:[#allocation7 + $0x60] sm:$0xff]  }
  0xa4   :  { %1243 = vmatpush3.bf16.msra.mxu0 %v1325_v14  ;;  %v1365_v14 = vld [vmem:[#allocation11 + $0x30] ss:$8 sps:$4 sm:$0xff]  }
  0xa5   :  { %1244 = vmatprep.subr.bf16.mxu0 %v1647_v0 }
  0xa8   :  { %1245 = vmatpush3.bf16.msra.mxu0 %v1326_v15  ;;  %v1370_v15 = vld [vmem:[#allocation11 + $0x44] ss:$8 sps:$4 sm:$0xff]  }
  0xa9   :  { %1246 = vmatprep.subr.bf16.mxu0 %v1647_v0 }
  0xac   :  { %1247 = vmatpush3.bf16.msra.mxu0 %v1327_v16 }
  0xad   :  { %1248 = vmatprep.subr.bf16.mxu0 %v1647_v0 }
  0xb0   :  { %1249 = vmatpush3.bf16.msra.mxu0 %v1328_v17  ;;  %v1368_v17 = vld [vmem:[#allocation11 + $0x40] ss:$8 sps:$4 sm:$0xff]  }
  0xb1   :  { %1250 = vmatprep.subr.bf16.mxu0 %v1647_v0 }
  0xb4   :  { %1251 = vmatpush3.bf16.msra.mxu0 %v1329_v18 }
  0xb5   :  { %1252 = vmatprep.subr.bf16.mxu0 %v1647_v0 }
  0xb8   :  { %1253 = vmatpush3.bf16.msra.mxu0 %v1330_v19  ;;  %v1373_v19 = vld [vmem:[#allocation11 + $0x54] ss:$8 sps:$4 sm:$0xff]  }
  0xb9   :  { %1254 = vmatprep.subr.bf16.mxu0 %v1647_v0 }
  0xbc   :  { %1255 = vmatpush3.bf16.msra.mxu0 %v1331_v20  ;;  %v1371_v20 = vld [vmem:[#allocation11 + $0x50] ss:$8 sps:$4 sm:$0xff]  }
  0xbd   :  { %1260 = vmatprep.subr.bf16.mxu0 %v1647_v0 }
  0xbf   :  { %1257 = vmatmul.mubr.bf16.vlgmr.msra.gmra.mrb[4].mxu0 %v425_v22  ;;  %v1376_v22 = vld [vmem:[#allocation11 + $0x64] ss:$8 sps:$4 sm:$0xff]  }
  0xc0   :  { %1276 = vmatprep.mubr.msk.bf16.mxu0 %vm1648_vm0, %v1647_v0  ;;  %1261 = vmatpush3.bf16.msra.mxu0 %v1380_v39  ;;  %v1393_v39 = vld [vmem:[#allocation7 + $0x68] sm:$0xff]  }
  0xc1   :  { %1262 = vmatprep.subr.bf16.mxu0 %v1647_v0 }
  0xc4   :  { %1263 = vmatpush3.bf16.msra.mxu0 %v1381_v40  ;;  %v1394_v40 = vld [vmem:[#allocation7 + $0x70] sm:$0xff]  }
  0xc5   :  { %1264 = vmatprep.subr.bf16.mxu0 %v1647_v0 }
  0xc8   :  { %1265 = vmatpush3.bf16.msra.mxu0 %v1382_v41  ;;  %v1395_v41 = vld [vmem:[#allocation7 + $0x78] sm:$0xff]  }
  0xc9   :  { %1266 = vmatprep.subr.bf16.mxu0 %v1647_v0 }
  0xcc   :  { %1267 = vmatpush3.bf16.msra.mxu0 %v1383_v42  ;;  %v276_v42 = vlaneseq }
  0xcd   :  { %1268 = vmatprep.subr.bf16.mxu0 %v1647_v0 }
  0xd0   :  { %1269 = vmatpush3.bf16.msra.mxu0 %v1384_v43  ;;  %v277_v43 = vshrl.u32 %v276_v42, 7 }
  0xd1   :  { %1270 = vmatprep.subr.bf16.mxu0 %v1647_v0 }
  0xd4   :  { %1271 = vmatpush3.bf16.msra.mxu0 %v1385_v44  ;;  %v1879_v44 = vsub.s32 0, %v277_v43 }
  0xd5   :  { %1272 = vmatprep.subr.bf16.mxu0 %v1647_v0 }
  0xd8   :  { %1273 = vmatpush3.bf16.msra.mxu0 %v1386_v32 }
  0xd9   :  { %1274 = vmatprep.subr.bf16.mxu0 %v1647_v0 }
  0xdc   :  { %1275 = vmatpush3.bf16.msra.mxu0 %v1387_v33 }
 0x172   :  { %v242_v46 = vpop.f32.mrb[0].mxu0 }
 0x173   :  { %v243_v47 = vadd.f32 %v1099_v45, %v242_v46  ;;  %v1238_v48 = vpop.f32.mrb[1].mxu0  ;;  %v274_v45 = vld [vmem:[%s1936_s6] sm:$0x3]  ;;  %v1884_v46 = vsub.s32 1, %v277_v43 }
 0x174   :  { %v245_v49 = vpop.f32.mrb[2].mxu0 }
 0x175   :  { %v249_v50 = vmul.f32 0.044715, %v243_v47  ;;  %v1239_v51 = vpop.f32.mrb[3].mxu0  ;;  %v248_v57 = vmul.f32 0.5, %v243_v47  ;;  %v283_v48 = vrot.slane %v274_v45, %v1884_v46 }
 0x177   :  { %v250_v52 = vmul.f32 %v249_v50, %v243_v47 }
 0x179   :  { %v251_v53 = vmul.f32 %v250_v52, %v243_v47 }
 0x17b   :  { %v252_v54 = vadd.f32 %v251_v53, %v243_v47  ;;  %v279_v47 = vrot.slane %v274_v45, %v1879_v44 }
 0x17d   :  { %v253_v55 = vmul.f32 0.7978846, %v252_v54 }
 0x17f   :  { %1420 = vtanh.f32 %v253_v55 }
 0x189   :  { %v1421_v56 = vpop.eup %1420 }
 0x18a   :  { %v255_v58 = vadd.f32 1.0, %v1421_v56 }
 0x18c   :  { %v256_v59 = vmul.f32 %v255_v58, %v248_v57  ;;  %v548_v57 = vld [vmem:[%s1938_s8] sm:$0x3] }
 0x18d   :  { %v553_v58 = vrot.slane %v548_v57, %v1879_v44 }
 0x18e   :  { %v273_v61 = vpack.c.bf16 %v256_v59, %v256_v59  ;;  %v557_v59 = vrot.slane %v548_v57, %v1884_v46 }
 0x190   :  { %399 = vmatmul.mubr.bf16.vlgmr.msra.gmra.mrb[0].mxu1 %v273_v61 }
 0x191   :  { %641 = vmatpush1.bf16.msra.mxu1 %v1356_v60  ;;  %672 = vmatprep.mubr.bf16.mxu1 %v1649_v30 }
 0x192   :  { %v516_v2 = vpop.f32.mrb[4].mxu0  ;;  %642 = vmatprep.subr.bf16.mxu1 %v1361_v62 }
 0x193   :  { %v517_v4 = vadd.f32 %v1125_v63, %v516_v2  ;;  %v1258_v5 = vpop.f32.mrb[5].mxu0 }
 0x194   :  { %v519_v6 = vpop.f32.mrb[6].mxu0 }
 0x195   :  { %v523_v7 = vmul.f32 0.044715, %v517_v4  ;;  %v1259_v8 = vpop.f32.mrb[7].mxu0  ;;  %643 = vmatpush1.bf16.msra.mxu1 %v1359_v1  ;;  %v522_v27 = vmul.f32 0.5, %v517_v4  ;;  %v1396_v6 = vld [vmem:[#allocation13] ss:$8 sps:$4 sm:$0xff]  }
 0x196   :  { %644 = vmatprep.subr.bf16.mxu1 %v1364_v3  ;;  %v1399_v8 = vld [vmem:[#allocation13 + $0x10] ss:$8 sps:$4 sm:$0xff]  }
 0x197   :  { %v524_v12 = vmul.f32 %v523_v7, %v517_v4  ;;  %v1401_v7 = vld [vmem:[#allocation13 + $0x14] ss:$8 sps:$4 sm:$0xff]  }
 0x199   :  { %v525_v13 = vmul.f32 %v524_v12, %v517_v4  ;;  %645 = vmatpush1.bf16.msra.mxu1 %v1362_v9  ;;  %v1404_v9 = vld [vmem:[#allocation13 + $0x24] ss:$8 sps:$4 sm:$0xff]   ;;  %v1405_v12 = vld [vmem:[#allocation13 + $0x30] ss:$8 sps:$4 sm:$0xff]  }
 0x19a   :  { %646 = vmatprep.subr.bf16.mxu1 %v1367_v10  ;;  %v1402_v10 = vld [vmem:[#allocation13 + $0x20] ss:$8 sps:$4 sm:$0xff]  }
 0x19b   :  { %v526_v16 = vadd.f32 %v525_v13, %v517_v4  ;;  %v1407_v13 = vld [vmem:[#allocation13 + $0x34] ss:$8 sps:$4 sm:$0xff]  }
 0x19d   :  { %647 = vmatpush1.bf16.msra.mxu1 %v1365_v14  ;;  %v527_v18 = vmul.f32 0.7978846, %v526_v16  ;;  %v1410_v14 = vld [vmem:[#allocation13 + $0x44] ss:$8 sps:$4 sm:$0xff]   ;;  %v1413_v16 = vld [vmem:[#allocation13 + $0x54] ss:$8 sps:$4 sm:$0xff]  }
 0x19e   :  { %648 = vmatprep.subr.bf16.mxu1 %v1370_v15  ;;  %v1408_v15 = vld [vmem:[#allocation13 + $0x40] ss:$8 sps:$4 sm:$0xff]  }
 0x19f   :  { %1422 = vtanh.f32 %v527_v18  ;;  %v1416_v18 = vld [vmem:[#allocation13 + $0x64] ss:$8 sps:$4 sm:$0xff]  }
 0x1a1   :  { %649 = vmatpush1.bf16.msra.mxu1 %v1368_v17  ;;  %v1411_v17 = vld [vmem:[#allocation13 + $0x50] ss:$8 sps:$4 sm:$0xff]  }
 0x1a2   :  { %650 = vmatprep.subr.bf16.mxu1 %v1373_v19  ;;  %v1414_v19 = vld [vmem:[#allocation13 + $0x60] ss:$8 sps:$4 sm:$0xff]  }
 0x1a5   :  { %651 = vmatpush1.bf16.msra.mxu1 %v1371_v20  ;;  %v1419_v20 = vld [vmem:[#allocation13 + $0x74] ss:$8 sps:$4 sm:$0xff]  }
 0x1a6   :  { %652 = vmatprep.subr.bf16.mxu1 %v1376_v22  ;;  %v1417_v22 = vld [vmem:[#allocation13 + $0x70] ss:$8 sps:$4 sm:$0xff]  }
 0x1a9   :  { %v1423_v25 = vpop.eup %1422  ;;  %653 = vmatpush1.bf16.msra.mxu1 %v1374_v23 }
 0x1aa   :  { %654 = vmatprep.subr.bf16.mxu1 %v1379_v24  ;;  %v529_v28 = vadd.f32 1.0, %v1423_v25 }
 0x1ac   :  { %v530_v29 = vmul.f32 %v529_v28, %v522_v27  ;;  %v1167_v28 = vld [vmem:[%s1934_s4 + $0x2] ss:$0 sm:$0xff]  ;;  %s1650_s4 = smov [#allocation14]  }
 0x1ad   :  { %655 = vmatpush1.bf16.msra.mxu1 %v1377_v26  ;;  %s1073_s25 = sshll.u32 %s1650_s4, 4  ;;  %s1074_s25 = int_to_ptr.vmem [resolvable:$true] %s1073_s25 }
 0x1ae   :  { %v547_v31 = vpack.c.bf16 %v530_v29, %v530_v29  ;;  %1280 = vmatprep.subr.bf16.mxu1 %v1647_v0  ;;  %p1585_p1 = scmp.lt.s32.totalorder %s1074_s25, %s1074_s25 }
 0x1b0   :  { %673 = vmatmul.mubr.bf16.vlgmr.msra.gmra.mrb[4].mxu1 %v547_v31 }
 0x1b1   :  { %1296 = vmatprep.mubr.msk.bf16.mxu1 %vm1648_vm0, %v1647_v0  ;;  %1281 = vmatpush3.bf16.msra.mxu1 %v1388_v34 }
 0x1b2   :  { %1282 = vmatprep.subr.bf16.mxu1 %v1647_v0 }
 0x1b5   :  { %1283 = vmatpush3.bf16.msra.mxu1 %v1389_v35 }
 0x1b6   :  { %1284 = vmatprep.subr.bf16.mxu1 %v1647_v0 }
 0x1b9   :  { %1285 = vmatpush3.bf16.msra.mxu1 %v1390_v36 }
 0x1ba   :  { %1286 = vmatprep.subr.bf16.mxu1 %v1647_v0 }
 0x1bd   :  { %1287 = vmatpush3.bf16.msra.mxu1 %v1391_v37 }
 0x1be   :  { %1288 = vmatprep.subr.bf16.mxu1 %v1647_v0 }
 0x1c1   :  { %1289 = vmatpush3.bf16.msra.mxu1 %v1392_v38 }
 0x1c2   :  { %1290 = vmatprep.subr.bf16.mxu1 %v1647_v0 }
 0x1c5   :  { %1291 = vmatpush3.bf16.msra.mxu1 %v1393_v39 }
 0x1c6   :  { %1292 = vmatprep.subr.bf16.mxu1 %v1647_v0 }
 0x1c9   :  { %1293 = vmatpush3.bf16.msra.mxu1 %v1394_v40 }
 0x1ca   :  { %1294 = vmatprep.subr.bf16.mxu1 %v1647_v0 }
 0x1cd   :  { %1295 = vmatpush3.bf16.msra.mxu1 %v1395_v41 }
 0x263   :  { %v400_v49 = vpop.f32.mrb[0].mxu1 }
 0x264   :  { %v401_v50 = vadd.f32 %v400_v49, %v279_v47  ;;  %v402_v51 = vpop.f32.mrb[1].mxu1  ;;  %v930_v47 = vld [vmem:[%s1940_s10] sm:$0x3]  ;;  %s1580_s10 = scalar_lea.vmem %s1074_s25, 128 }
 0x265   :  { %v403_v0 = vadd.f32 %v402_v51, %v283_v48  ;;  %v404_v52 = vpop.f32.mrb[2].mxu1  ;;  %v935_v48 = vrot.slane %v930_v47, %v1879_v44  ;;  %v939_v49 = vrot.slane %v930_v47, %v1884_v46  ;;  %p1581_p0 = scmp.ne.s32.totalorder %s1074_s25, %s1580_s10  ;;  %p1586_p2 = scmp.lt.s32.totalorder %s1580_s10, %s1580_s10 }
 0x266   :  { %v407_v53 = vmul.f32 %v401_v50, %v1846_v21  ;;  %v405_v54 = vpop.f32.mrb[3].mxu1 }
 0x267   :  { %p1587_p3 = por %p1586_p2, %p1585_p1 }
 0x268   :  { %v408_v55 = vadd.f32 %v407_v53, %v403_v0 }
 0x269   :  { %p1588_p4 = pnand %p1587_p3, %p1581_p0 }
 0x26a   :  { %v718_v56 = vpack.c.bf16 %v408_v55, %v408_v55 }
 0x26c   :  { %1277 = vmatmul.mubr.bf16.vlgmr.msra.gmra.mrb[8].mxu0 %v718_v56 }
 0x26d   :  { %1054 = vmatprep.mubr.bf16.mxu0 %v1649_v30  ;;  %v1398_v30 = vld [vmem:[#allocation13 + $0x4] ss:$8 sps:$4 sm:$0xff]  }
 0x26e   :  { %1022 = vmatprep.subr.bf16.mxu0 %v1398_v30 }
 0x26f   :  { %1023 = vmatpush1.bf16.msra.mxu0 %v1396_v6 }
 0x270   :  { %1024 = vmatprep.subr.bf16.mxu0 %v1401_v7 }
 0x273   :  { %1025 = vmatpush1.bf16.msra.mxu0 %v1399_v8 }
 0x274   :  { %1026 = vmatprep.subr.bf16.mxu0 %v1404_v9 }
 0x277   :  { %1027 = vmatpush1.bf16.msra.mxu0 %v1402_v10 }
 0x278   :  { %1028 = vmatprep.subr.bf16.mxu0 %v1407_v13 }
 0x27b   :  { %1029 = vmatpush1.bf16.msra.mxu0 %v1405_v12 }
 0x27c   :  { %1030 = vmatprep.subr.bf16.mxu0 %v1410_v14 }
 0x27f   :  { %1031 = vmatpush1.bf16.msra.mxu0 %v1408_v15 }
 0x280   :  { %1032 = vmatprep.subr.bf16.mxu0 %v1413_v16 }
 0x283   :  { %v674_v60 = vpop.f32.mrb[4].mxu1  ;;  %1033 = vmatpush1.bf16.msra.mxu0 %v1411_v17 }
 0x284   :  { %v675_v61 = vadd.f32 %v674_v60, %v553_v58  ;;  %v676_v62 = vpop.f32.mrb[5].mxu1  ;;  %1034 = vmatprep.subr.bf16.mxu0 %v1416_v18 }
 0x285   :  { %v677_v63 = vadd.f32 %v676_v62, %v557_v59  ;;  %v678_v1 = vpop.f32.mrb[6].mxu1 }
 0x286   :  { %v681_v2 = vmul.f32 %v675_v61, %v1832_v11  ;;  %v679_v3 = vpop.f32.mrb[7].mxu1 }
 0x287   :  { %1035 = vmatpush1.bf16.msra.mxu0 %v1414_v19 }
 0x288   :  { %v682_v4 = vadd.f32 %v681_v2, %v677_v63  ;;  %1036 = vmatprep.subr.bf16.mxu0 %v1419_v20 }
 0x28a   :  { %v700_v5 = vpack.c.bf16 %v682_v4, %v682_v4 }
 0x28b   :  { %1037 = vmatpush1.bf16.msra.mxu0 %v1417_v22 }
 0x28c   :  { %1297 = vmatmul.mubr.bf16.vlgmr.msra.gmra.mrb[8].mxu1 %v700_v5 }
 0x33f   :  { %v801_v23 = vpop.f32.mrb[8].mxu0 }
 0x340   :  { %v1278_v24 = vpop.f32.mrb[9].mxu0 }
 0x341   :  { %v804_v25 = vpop.f32.mrb[10].mxu0 }
 0x342   :  { %v1279_v26 = vpop.f32.mrb[11].mxu0 }
 0x35f   :  { %v889_v27 = vpop.f32.mrb[8].mxu1 }
 0x360   :  { %v890_v29 = vadd.f32 %v889_v27, %v801_v23  ;;  %v1298_v31 = vpop.f32.mrb[9].mxu1 }
 0x361   :  { %v892_v32 = vpop.f32.mrb[10].mxu1 }
 0x362   :  { %v903_v33 = vadd.f32 %v1167_v28, %v890_v29  ;;  %v1299_v34 = vpop.f32.mrb[11].mxu1 }
 0x364   :  { %v905_v35 = vmul.f32 0.044715, %v903_v33  ;;  %v904_v41 = vmul.f32 0.5, %v903_v33 }
 0x366   :  { %v906_v36 = vmul.f32 %v905_v35, %v903_v33 }
 0x368   :  { %v907_v37 = vmul.f32 %v906_v36, %v903_v33 }
 0x36a   :  { %v908_v38 = vadd.f32 %v907_v37, %v903_v33 }
 0x36c   :  { %v909_v39 = vmul.f32 0.7978846, %v908_v38 }
 0x36e   :  { %1424 = vtanh.f32 %v909_v39 }
 0x378   :  { %v1425_v40 = vpop.eup %1424 }
 0x379   :  { %v911_v42 = vadd.f32 1.0, %v1425_v40 }
 0x37b   :  { %v912_v43 = vmul.f32 %v911_v42, %v904_v41 }
 0x37d   :  { %v929_v45 = vpack.c.bf16 %v912_v43, %v912_v43 }
 0x37f   :  { %1055 = vmatmul.mubr.bf16.vlgmr.msra.gmra.mrb[12].mxu0 %v929_v45 }
 0x452   :  { %v1056_v50 = vpop.f32.mrb[12].mxu0 }
 0x453   :  { %v1057_v51 = vadd.f32 %v1056_v50, %v935_v48  ;;  %v1058_v0 = vpop.f32.mrb[13].mxu0 }
 0x454   :  { %v1059_v52 = vadd.f32 %v1058_v0, %v939_v49  ;;  %v1060_v53 = vpop.f32.mrb[14].mxu0 }
 0x455   :  { %v1063_v54 = vadd.f32 %v1057_v51, %v1832_v11  ;;  %v1061_v55 = vpop.f32.mrb[15].mxu0 }
 0x456   :  { %v1065_v56 = vadd.f32 %v1059_v52, %v1846_v21 }
 0x457   :  { %1064 = vst [vmem:[#allocation14] sm:$0xff] %v1063_v54 }
 0x458   :  { %1066 = vst [vmem:[#allocation15] sm:$0xff] %v1065_v56 }
 0x459   :  { %1591 = shalt.err (!%p1588_p4)
}
 0x45a   :  { %s1592_s26 = scalar_lea.hbm %s1941_s11, 128 }
 0x45b   :  { %p1593_p5 = scmp.ne.s32.totalorder %s1941_s11, %s1592_s26  ;;  %p1596_p6 = scmp.lt.u32.totalorder %s1592_s26, %s1941_s11 }
 0x45d   :  { %p1598_p7 = pnand %p1596_p6, %p1593_p5 }
 0x45f   :  { %1601 = shalt.err (!%p1598_p7)
}
 0x460   :  { %1076 = dma.vmem_to_hbm [thread:$0]  %s1074_s25, 128, %s1941_s11, [#allocation4]  }
 0x461   :  { %s1602_s15 = scalar_lea.vmem %s1084_s1, 128  ;;  %p1607_p9 = scmp.lt.s32.totalorder %s1084_s1, %s1084_s1 }
 0x462   :  { %p1603_p8 = scmp.ne.s32.totalorder %s1084_s1, %s1602_s15  ;;  %p1608_p10 = scmp.lt.s32.totalorder %s1602_s15, %s1602_s15 }
 0x464   :  { %p1609_p11 = por %p1608_p10, %p1607_p9 }
 0x466   :  { %p1610_p12 = pnand %p1609_p11, %p1603_p8 }
 0x468   :  { %1613 = shalt.err (!%p1610_p12)
}
 0x469   :  { %s1614_s9 = scalar_lea.hbm %s1942_s12, 128 }
 0x46a   :  { %p1615_p13 = scmp.ne.s32.totalorder %s1942_s12, %s1614_s9  ;;  %p1618_p0 = scmp.lt.u32.totalorder %s1614_s9, %s1942_s12 }
 0x46c   :  { %p1620_p1 = pnand %p1618_p0, %p1615_p13 }
 0x46e   :  { %1623 = shalt.err (!%p1620_p1)
}
 0x46f   :  { %1086 = dma.vmem_to_hbm [thread:$0]  %s1084_s1, 128, %s1942_s12, [#allocation16]  }
 0x470   :  { %1632 = dma.done.wait [#allocation4], 128  }
 0x471   :  { %1633 = vsyncadd [#allocation4], 4294967168 }
 0x472   :  { %1634 = dma.done.wait [#allocation16], 128  }
 0x473   :  { %1635 = vsyncadd [#allocation16], 4294967168 }
 0x474   :  { %1093 = vsyncpa [#allocation3], 1 }
 0x475   :  { %1094 = vsyncpa [#allocation6], 1 }
 0x476   :  { %1095 = vsyncpa [#allocation9], 1 }
 0x477   :  { %1096 = vsyncpa [#allocation12], 1 }
 0x478   :  { %1097 = vsyncpa [#allocation4], 1 }
 0x479   :  { %1098 = vsyncpa [#allocation16], 1 }

// kernel: tpu_custom_call.1
= control target key start
LH: loop header
LB: loop body
LE: loop exit
PB: predicated region body
PF: predicated region fallthrough
CT: control target
= control target key end

     0   :  { %18 = vsyncpa [#allocation3], 0  ;;  %s1930_s0 = inlined_call_operand.hbm [shape: f32[8,128], index: 0, kind: input, shape index: {}]   ;;  %s1931_s1 = inlined_call_operand.hbm [shape: f32[8,128], index: 1, kind: input, shape index: {}]   ;;  %s1932_s2 = inlined_call_operand.hbm [shape: bf16[2,128,128], index: 2, kind: input, shape index: {}]   ;;  %s1933_s3 = inlined_call_operand.hbm [shape: bf16[2,128,128], index: 3, kind: input, shape index: {}]   ;;  %s1934_s4 = inlined_call_operand.vmem [shape: f32[3,1,128], index: 4, kind: input, shape index: {}]   ;;  %s1935_s5 = inlined_call_operand.hbm [shape: bf16[128,256], index: 5, kind: input, shape index: {}]   ;;  %s1936_s6 = inlined_call_operand.vmem [shape: f32[1,256], index: 6, kind: input, shape index: {}]   ;;  %s1937_s7 = inlined_call_operand.hbm [shape: bf16[128,256], index: 7, kind: input, shape index: {}]   ;;  %s1938_s8 = inlined_call_operand.vmem [shape: f32[1,256], index: 8, kind: input, shape index: {}]   ;;  %s1939_s9 = inlined_call_operand.hbm [shape: bf16[128,256], index: 9, kind: input, shape index: {}]   ;;  %s1940_s10 = inlined_call_operand.vmem [shape: f32[1,256], index: 10, kind: input, shape index: {}]   ;;  %s1941_s11 = inlined_call_operand.hbm [shape: f32[8,128], index: 11, kind: output, shape index: {0}]   ;;  %s1942_s12 = inlined_call_operand.hbm [shape: f32[8,128], index: 12, kind: output, shape index: {1}]  }
   0x1   :  { %19 = vsyncpa [#allocation6], 0 }
   0x2   :  { %20 = vsyncpa [#allocation9], 0 }
   0x3   :  { %21 = vsyncpa [#allocation12], 0 }
   0x4   :  { %22 = vsyncpa [#allocation4], 0 }
   0x5   :  { %23 = vsyncpa [#allocation16], 0  ;;  %s1636_s21 = smov [#allocation5]   ;;  %s1426_s25 = scalar_lea.hbm %s1931_s1, 128 }
   0x6   :  { %s40_s22 = sshll.u32 %s1636_s21, 4  ;;  %p1427_p0 = scmp.ne.s32.totalorder %s1931_s1, %s1426_s25  ;;  %s41_s22 = int_to_ptr.vmem [resolvable:$true] %s40_s22 }
   0x7   :  { %p1430_p1 = scmp.lt.u32.totalorder %s1426_s25, %s1931_s1 }
   0x9   :  { %p1432_p2 = pnand %p1430_p1, %p1427_p0 }
   0xb   :  { %1435 = shalt.err (!%p1432_p2)
}
   0xc   :  { %s1436_s30 = scalar_lea.vmem %s41_s22, 128  ;;  %p1441_p4 = scmp.lt.s32.totalorder %s41_s22, %s41_s22 }
   0xd   :  { %p1437_p3 = scmp.ne.s32.totalorder %s41_s22, %s1436_s30  ;;  %p1442_p5 = scmp.lt.s32.totalorder %s1436_s30, %s1436_s30 }
   0xf   :  { %p1443_p6 = por %p1442_p5, %p1441_p4 }
  0x11   :  { %p1444_p7 = pnand %p1443_p6, %p1437_p3 }
  0x13   :  { %1447 = shalt.err (!%p1444_p7)
}
  0x14   :  { %43 = dma.hbm_to_vmem [thread:$0]  %s1931_s1, 128, %s41_s22, [#allocation6]  }
  0x15   :  { %s1637_s15 = smov [#allocation8]   ;;  %s1448_s19 = scalar_lea.hbm %s1933_s3, 2048 }
  0x16   :  { %s61_s16 = sshll.u32 %s1637_s15, 4  ;;  %p1449_p8 = scmp.ne.s32.totalorder %s1933_s3, %s1448_s19  ;;  %s62_s16 = int_to_ptr.vmem [resolvable:$true] %s61_s16 }
  0x17   :  { %p1452_p9 = scmp.lt.u32.totalorder %s1448_s19, %s1933_s3 }
  0x19   :  { %p1454_p10 = pnand %p1452_p9, %p1449_p8 }
  0x1b   :  { %1457 = shalt.err (!%p1454_p10)
}
  0x1c   :  { %s1458_s25 = scalar_lea.vmem %s62_s16, 2048  ;;  %p1463_p12 = scmp.lt.s32.totalorder %s62_s16, %s62_s16 }
  0x1d   :  { %p1459_p11 = scmp.ne.s32.totalorder %s62_s16, %s1458_s25  ;;  %p1464_p13 = scmp.lt.s32.totalorder %s1458_s25, %s1458_s25 }
  0x1f   :  { %p1465_p0 = por %p1464_p13, %p1463_p12 }
  0x21   :  { %p1466_p1 = pnand %p1465_p0, %p1459_p11 }
  0x23   :  { %1469 = shalt.err (!%p1466_p1)
}
  0x24   :  { %s1638_s1 = smov 64   ;;  %s1639_s22 = smov 4  }
  0x25   :  { %67 = dma.hbm_to_vmem [thread:$0]  %s1933_s3, 2048, %s62_s16, [#allocation9], %s1638_s1, %s1638_s1, %s1639_s22  }
  0x26   :  { %s1640_s28 = smov [#allocation11]   ;;  %s1641_s30 = smov [#allocation2]  }
  0x27   :  { %s89_s29 = sshll.u32 %s1640_s28, 4  ;;  %s30_s13 = sshll.u32 %s1641_s30, 4  ;;  %s90_s29 = int_to_ptr.vmem [resolvable:$true] %s89_s29  ;;  %s31_s13 = int_to_ptr.vmem [resolvable:$true] %s30_s13 }
  0x28   :  { %s1470_s17 = scalar_lea.hbm %s1937_s7, 2048 }
  0x29   :  { %p1471_p2 = scmp.ne.s32.totalorder %s1937_s7, %s1470_s17  ;;  %p1474_p3 = scmp.lt.u32.totalorder %s1470_s17, %s1937_s7 }
  0x2b   :  { %p1476_p4 = pnand %p1474_p3, %p1471_p2 }
  0x2d   :  { %1479 = shalt.err (!%p1476_p4)
}
  0x2e   :  { %s1480_s3 = scalar_lea.vmem %s90_s29, 2048  ;;  %p1485_p6 = scmp.lt.s32.totalorder %s90_s29, %s90_s29 }
  0x2f   :  { %p1481_p5 = scmp.ne.s32.totalorder %s90_s29, %s1480_s3  ;;  %p1486_p7 = scmp.lt.s32.totalorder %s1480_s3, %s1480_s3 }
  0x31   :  { %p1487_p8 = por %p1486_p7, %p1485_p6 }
  0x33   :  { %p1488_p9 = pnand %p1487_p8, %p1481_p5 }
  0x35   :  { %1491 = shalt.err (!%p1488_p9)
}
  0x36   :  { %s1642_s16 = smov 128   ;;  %s1643_s23 = smov 8  }
  0x37   :  { %95 = dma.hbm_to_vmem [thread:$0]  %s1937_s7, 2048, %s90_s29, [#allocation12], %s1642_s16, %s1642_s16, %s1643_s23  }
  0x38   :  { %s1492_s28 = scalar_lea.hbm %s1930_s0, 128 }
  0x39   :  { %p1493_p10 = scmp.ne.s32.totalorder %s1930_s0, %s1492_s28  ;;  %p1496_p11 = scmp.lt.u32.totalorder %s1492_s28, %s1930_s0 }
  0x3b   :  { %p1498_p12 = pnand %p1496_p11, %p1493_p10 }
  0x3d   :  { %1501 = shalt.err (!%p1498_p12)
}
  0x3e   :  { %s1502_s18 = scalar_lea.vmem %s31_s13, 128  ;;  %p1507_p0 = scmp.lt.s32.totalorder %s31_s13, %s31_s13 }
  0x3f   :  { %p1503_p13 = scmp.ne.s32.totalorder %s31_s13, %s1502_s18  ;;  %p1508_p1 = scmp.lt.s32.totalorder %s1502_s18, %s1502_s18 }
  0x41   :  { %p1509_p2 = por %p1508_p1, %p1507_p0 }
  0x43   :  { %p1510_p3 = pnand %p1509_p2, %p1503_p13 }
  0x45   :  { %1513 = shalt.err (!%p1510_p3)
}
  0x46   :  { %33 = dma.hbm_to_vmem [thread:$0]  %s1930_s0, 128, %s31_s13, [#allocation3]  }
  0x47   :  { %s1644_s19 = smov [#allocation7]   ;;  %s1645_s21 = smov [#allocation10]  }
  0x48   :  { %s49_s20 = sshll.u32 %s1644_s19, 4  ;;  %s75_s3 = sshll.u32 %s1645_s21, 4  ;;  %s50_s20 = int_to_ptr.vmem [resolvable:$true] %s49_s20  ;;  %s1771_s3 = int_to_ptr.vmem [resolvable:$true] %s75_s3 }
  0x49   :  { %s1514_s26 = scalar_lea.hbm %s1932_s2, 2048 }
  0x4a   :  { %p1515_p4 = scmp.ne.s32.totalorder %s1932_s2, %s1514_s26  ;;  %p1518_p5 = scmp.lt.u32.totalorder %s1514_s26, %s1932_s2 }
  0x4c   :  { %p1520_p6 = pnand %p1518_p5, %p1515_p4 }
  0x4e   :  { %1523 = shalt.err (!%p1520_p6)
}
  0x4f   :  { %s1524_s0 = scalar_lea.vmem %s50_s20, 2048  ;;  %p1529_p8 = scmp.lt.s32.totalorder %s50_s20, %s50_s20 }
  0x50   :  { %p1525_p7 = scmp.ne.s32.totalorder %s50_s20, %s1524_s0  ;;  %p1530_p9 = scmp.lt.s32.totalorder %s1524_s0, %s1524_s0 }
  0x52   :  { %p1531_p10 = por %p1530_p9, %p1529_p8 }
  0x54   :  { %p1532_p11 = pnand %p1531_p10, %p1525_p7 }
  0x56   :  { %1535 = shalt.err (!%p1532_p11)
}
  0x57   :  { %55 = dma.hbm_to_vmem [thread:$0]  %s1932_s2, 2048, %s50_s20, [#allocation6], %s1638_s1, %s1638_s1, %s1639_s22  }
  0x58   :  { %s1536_s7 = scalar_lea.hbm %s1935_s5, 2048 }
  0x59   :  { %p1537_p12 = scmp.ne.s32.totalorder %s1935_s5, %s1536_s7  ;;  %p1540_p13 = scmp.lt.u32.totalorder %s1536_s7, %s1935_s5 }
  0x5b   :  { %p1542_p0 = pnand %p1540_p13, %p1537_p12 }
  0x5d   :  { %1545 = shalt.err (!%p1542_p0)
}
  0x5e   :  { %s1546_s25 = scalar_lea.vmem %s1771_s3, 2048  ;;  %p1551_p2 = scmp.lt.s32.totalorder %s1771_s3, %s1771_s3 }
  0x5f   :  { %p1547_p1 = scmp.ne.s32.totalorder %s1771_s3, %s1546_s25  ;;  %p1552_p3 = scmp.lt.s32.totalorder %s1546_s25, %s1546_s25 }
  0x61   :  { %p1553_p4 = por %p1552_p3, %p1551_p2 }
  0x63   :  { %p1554_p5 = pnand %p1553_p4, %p1547_p1 }
  0x65   :  { %1557 = shalt.err (!%p1554_p5)
}
  0x66   :  { %81 = dma.hbm_to_vmem [thread:$0]  %s1935_s5, 2048, %s1771_s3, [#allocation9], %s1642_s16, %s1642_s16, %s1643_s23  }
  0x67   :  { %s1646_s22 = smov [#allocation13]   ;;  %s1558_s28 = scalar_lea.hbm %s1939_s9, 2048 }
  0x68   :  { %s103_s20 = sshll.u32 %s1646_s22, 4  ;;  %p1559_p6 = scmp.ne.s32.totalorder %s1939_s9, %s1558_s28  ;;  %s104_s20 = int_to_ptr.vmem [resolvable:$true] %s103_s20 }
  0x69   :  { %p1562_p7 = scmp.lt.u32.totalorder %s1558_s28, %s1939_s9 }
  0x6b   :  { %p1564_p8 = pnand %p1562_p7, %p1559_p6 }
  0x6d   :  { %1567 = shalt.err (!%p1564_p8)
}
  0x6e   :  { %s1568_s15 = scalar_lea.vmem %s104_s20, 2048  ;;  %p1573_p10 = scmp.lt.s32.totalorder %s104_s20, %s104_s20 }
  0x6f   :  { %p1569_p9 = scmp.ne.s32.totalorder %s104_s20, %s1568_s15  ;;  %p1574_p11 = scmp.lt.s32.totalorder %s1568_s15, %s1568_s15 }
  0x71   :  { %p1575_p12 = por %p1574_p11, %p1573_p10 }
  0x73   :  { %p1576_p13 = pnand %p1575_p12, %p1569_p9 }
  0x75   :  { %1579 = shalt.err (!%p1576_p13)
}
  0x76   :  { %109 = dma.hbm_to_vmem [thread:$0]  %s1939_s9, 2048, %s104_s20, [#allocation12], %s1642_s16, %s1642_s16, %s1643_s23  }
  0x77   :  { %1624 = dma.done.wait [#allocation3], 128  }
  0x78   :  { %1625 = vsyncadd [#allocation3], 4294967168 }
  0x79   :  { %1626 = dma.done.wait [#allocation6], 2176  }
  0x7a   :  { %1627 = vsyncadd [#allocation6], 4294965120 }
  0x7b   :  { %1628 = dma.done.wait [#allocation9], 4096  }
  0x7c   :  { %1629 = vsyncadd [#allocation9], 4294963200 }
  0x7d   :  { %1630 = dma.done.wait [#allocation12], 4096  }
  0x7e   :  { %1631 = vsyncadd [#allocation12], 4294963200  ;;  %v1647_v0 = vmov 0.0   ;;  %vm1648_vm0 = vmmov 0   ;;  %v1316_v1 = vld [vmem:[#allocation7] sm:$0xff]   ;;  %v1317_v2 = vld [vmem:[#allocation7 + $0x8] sm:$0xff]  }
  0x7f   :  { %1220 = vmatprep.subr.bf16.mxu0 %v1647_v0  ;;  %1236 = vmatprep.mubr.msk.bf16.mxu0 %vm1648_vm0, %v1647_v0  ;;  %v1318_v3 = vld [vmem:[#allocation7 + $0x10] sm:$0xff]   ;;  %v1319_v4 = vld [vmem:[#allocation7 + $0x18] sm:$0xff]   ;;  %v1320_v5 = vld [vmem:[#allocation7 + $0x20] sm:$0xff]   ;;  %v1649_v30 = vmov 0   ;;  %s1651_s2 = smov [#allocation15]  }
  0x80   :  { %1221 = vmatpush3.bf16.msra.mxu0 %v1316_v1  ;;  %v1332_v6 = vld [vmem:[#allocation10 + $0x4] ss:$8 sps:$4 sm:$0xff]   ;;  %v1334_v7 = vld [vmem:[#allocation10] ss:$8 sps:$4 sm:$0xff]   ;;  %v1322_v9 = vld [vmem:[#allocation7 + $0x30] sm:$0xff]   ;;  %398 = vmatprep.mubr.bf16.mxu1 %v1649_v30  ;;  %s1083_s1 = sshll.u32 %s1651_s2, 4  ;;  %s1084_s1 = int_to_ptr.vmem [resolvable:$true] %s1083_s1 }
  0x81   :  { %1222 = vmatprep.subr.bf16.mxu0 %v1647_v0  ;;  %v1321_v8 = vld [vmem:[#allocation7 + $0x28] sm:$0xff]   ;;  %366 = vmatprep.subr.bf16.mxu1 %v1332_v6  ;;  %v1323_v10 = vld [vmem:[#allocation7 + $0x38] sm:$0xff]   ;;  %v1832_v11 = vld [vmem:[#allocation2] sm:$0xff] }
  0x82   :  { %367 = vmatpush1.bf16.msra.mxu1 %v1334_v7  ;;  %v1324_v12 = vld [vmem:[#allocation8] sm:$0xff]   ;;  %v152_v13 = vpack.c.bf16 %v1832_v11, %v1832_v11  ;;  %v1325_v14 = vld [vmem:[#allocation8 + $0x8] sm:$0xff]   ;;  %v1326_v15 = vld [vmem:[#allocation8 + $0x10] sm:$0xff]  }
  0x83   :  { %v1327_v16 = vld [vmem:[#allocation8 + $0x18] sm:$0xff]   ;;  %v1328_v17 = vld [vmem:[#allocation8 + $0x20] sm:$0xff]   ;;  %v1329_v18 = vld [vmem:[#allocation8 + $0x28] sm:$0xff]  }
  0x84   :  { %1223 = vmatpush3.bf16.msra.mxu0 %v1317_v2  ;;  %v1330_v19 = vld [vmem:[#allocation8 + $0x30] sm:$0xff]   ;;  %v1331_v20 = vld [vmem:[#allocation8 + $0x38] sm:$0xff]   ;;  %v1338_v25 = vld [vmem:[#allocation10 + $0x24] ss:$8 sps:$4 sm:$0xff]  }
  0x85   :  { %1224 = vmatprep.subr.bf16.mxu0 %v1647_v0  ;;  %v1846_v21 = vld [vmem:[#allocation5] sm:$0xff]  ;;  %v1340_v26 = vld [vmem:[#allocation10 + $0x20] ss:$8 sps:$4 sm:$0xff]   ;;  %v1344_v29 = vld [vmem:[#allocation10 + $0x44] ss:$8 sps:$4 sm:$0xff]  }
  0x86   :  { %v425_v22 = vpack.c.bf16 %v1846_v21, %v1846_v21  ;;  %v1335_v23 = vld [vmem:[#allocation10 + $0x14] ss:$8 sps:$4 sm:$0xff]   ;;  %v1337_v24 = vld [vmem:[#allocation10 + $0x10] ss:$8 sps:$4 sm:$0xff]   ;;  %v1346_v31 = vld [vmem:[#allocation10 + $0x40] ss:$8 sps:$4 sm:$0xff]  }
  0x87   :  { %368 = vmatprep.subr.bf16.mxu1 %v1335_v23  ;;  %v1341_v27 = vld [vmem:[#allocation10 + $0x34] ss:$8 sps:$4 sm:$0xff]   ;;  %v1343_v28 = vld [vmem:[#allocation10 + $0x30] ss:$8 sps:$4 sm:$0xff]   ;;  %v1350_v34 = vld [vmem:[#allocation10 + $0x64] ss:$8 sps:$4 sm:$0xff]  }
  0x88   :  { %1225 = vmatpush3.bf16.msra.mxu0 %v1318_v3  ;;  %369 = vmatpush1.bf16.msra.mxu1 %v1337_v24  ;;  %v1347_v32 = vld [vmem:[#allocation10 + $0x54] ss:$8 sps:$4 sm:$0xff]   ;;  %v1349_v33 = vld [vmem:[#allocation10 + $0x50] ss:$8 sps:$4 sm:$0xff]   ;;  %v1352_v35 = vld [vmem:[#allocation10 + $0x60] ss:$8 sps:$4 sm:$0xff]  }
  0x89   :  { %1226 = vmatprep.subr.bf16.mxu0 %v1647_v0  ;;  %370 = vmatprep.subr.bf16.mxu1 %v1338_v25  ;;  %v1353_v36 = vld [vmem:[#allocation10 + $0x74] ss:$8 sps:$4 sm:$0xff]   ;;  %v1355_v37 = vld [vmem:[#allocation10 + $0x70] ss:$8 sps:$4 sm:$0xff]   ;;  %v1358_v38 = vld [vmem:[#allocation11 + $0x4] ss:$8 sps:$4 sm:$0xff]  }
  0x8a   :  { %v1380_v39 = vld [vmem:[#allocation8 + $0x40] sm:$0xff]   ;;  %v1381_v40 = vld [vmem:[#allocation8 + $0x48] sm:$0xff]   ;;  %v1382_v41 = vld [vmem:[#allocation8 + $0x50] sm:$0xff]  }
  0x8b   :  { %v1383_v42 = vld [vmem:[#allocation8 + $0x58] sm:$0xff]   ;;  %v1384_v43 = vld [vmem:[#allocation8 + $0x60] sm:$0xff]   ;;  %v1385_v44 = vld [vmem:[#allocation8 + $0x68] sm:$0xff]  }
  0x8c   :  { %1227 = vmatpush3.bf16.msra.mxu0 %v1319_v4  ;;  %371 = vmatpush1.bf16.msra.mxu1 %v1340_v26  ;;  %v1099_v45 = vld [vmem:[%s1934_s4] ss:$0 sm:$0xff]  ;;  %v1356_v60 = vld [vmem:[#allocation11] ss:$8 sps:$4 sm:$0xff]   ;;  %v1361_v62 = vld [vmem:[#allocation11 + $0x14] ss:$8 sps:$4 sm:$0xff]  }
  0x8d   :  { %1228 = vmatprep.subr.bf16.mxu0 %v1647_v0  ;;  %372 = vmatprep.subr.bf16.mxu1 %v1341_v27  ;;  %v1125_v63 = vld [vmem:[%s1934_s4 + $0x1] ss:$0 sm:$0xff]  ;;  %v1364_v3 = vld [vmem:[#allocation11 + $0x24] ss:$8 sps:$4 sm:$0xff]   ;;  %v1374_v23 = vld [vmem:[#allocation11 + $0x60] ss:$8 sps:$4 sm:$0xff]  }
  0x8e   :  { %v1359_v1 = vld [vmem:[#allocation11 + $0x10] ss:$8 sps:$4 sm:$0xff]   ;;  %v1379_v24 = vld [vmem:[#allocation11 + $0x74] ss:$8 sps:$4 sm:$0xff]  }
  0x8f   :  { %v1377_v26 = vld [vmem:[#allocation11 + $0x70] ss:$8 sps:$4 sm:$0xff]  }
  0x90   :  { %1229 = vmatpush3.bf16.msra.mxu0 %v1320_v5  ;;  %373 = vmatpush1.bf16.msra.mxu1 %v1343_v28 }
  0x91   :  { %1230 = vmatprep.subr.bf16.mxu0 %v1647_v0  ;;  %374 = vmatprep.subr.bf16.mxu1 %v1344_v29 }
  0x94   :  { %1231 = vmatpush3.bf16.msra.mxu0 %v1321_v8  ;;  %375 = vmatpush1.bf16.msra.mxu1 %v1346_v31 }
  0x95   :  { %1232 = vmatprep.subr.bf16.mxu0 %v1647_v0  ;;  %376 = vmatprep.subr.bf16.mxu1 %v1347_v32  ;;  %v1386_v32 = vld [vmem:[#allocation8 + $0x70] sm:$0xff]  }
  0x98   :  { %1233 = vmatpush3.bf16.msra.mxu0 %v1322_v9  ;;  %377 = vmatpush1.bf16.msra.mxu1 %v1349_v33  ;;  %v1362_v9 = vld [vmem:[#allocation11 + $0x20] ss:$8 sps:$4 sm:$0xff]   ;;  %v1387_v33 = vld [vmem:[#allocation8 + $0x78] sm:$0xff]  }
  0x99   :  { %1234 = vmatprep.subr.bf16.mxu0 %v1647_v0  ;;  %378 = vmatprep.subr.bf16.mxu1 %v1350_v34  ;;  %v1388_v34 = vld [vmem:[#allocation7 + $0x40] sm:$0xff]  }
  0x9c   :  { %1235 = vmatpush3.bf16.msra.mxu0 %v1323_v10  ;;  %379 = vmatpush1.bf16.msra.mxu1 %v1352_v35  ;;  %v1367_v10 = vld [vmem:[#allocation11 + $0x34] ss:$8 sps:$4 sm:$0xff]   ;;  %v1389_v35 = vld [vmem:[#allocation7 + $0x48] sm:$0xff]  }
  0x9d   :  { %1240 = vmatprep.subr.bf16.mxu0 %v1647_v0  ;;  %380 = vmatprep.subr.bf16.mxu1 %v1353_v36  ;;  %v1390_v36 = vld [vmem:[#allocation7 + $0x50] sm:$0xff]  }
  0x9f   :  { %1237 = vmatmul.mubr.bf16.vlgmr.msra.gmra.mrb[0].mxu0 %v152_v13 }
  0xa0   :  { %1241 = vmatpush3.bf16.msra.mxu0 %v1324_v12  ;;  %1256 = vmatprep.mubr.msk.bf16.mxu0 %vm1648_vm0, %v1647_v0 }
  0xa1   :  { %1242 = vmatprep.subr.bf16.mxu0 %v1647_v0  ;;  %381 = vmatpush1.bf16.msra.mxu1 %v1355_v37  ;;  %v1391_v37 = vld [vmem:[#allocation7 + $0x58] sm:$0xff]  }
  0xa2   :  { %640 = vmatprep.subr.bf16.mxu1 %v1358_v38  ;;  %v1392_v38 = vld [vmem:[#allocation7 + $0x60] sm:$0xff]  }
  0xa4   :  { %1243 = vmatpush3.bf16.msra.mxu0 %v1325_v14  ;;  %v1365_v14 = vld [vmem:[#allocation11 + $0x30] ss:$8 sps:$4 sm:$0xff]  }
  0xa5   :  { %1244 = vmatprep.subr.bf16.mxu0 %v1647_v0 }
  0xa8   :  { %1245 = vmatpush3.bf16.msra.mxu0 %v1326_v15  ;;  %v1370_v15 = vld [vmem:[#allocation11 + $0x44] ss:$8 sps:$4 sm:$0xff]  }
  0xa9   :  { %1246 = vmatprep.subr.bf16.mxu0 %v1647_v0 }
  0xac   :  { %1247 = vmatpush3.bf16.msra.mxu0 %v1327_v16 }
  0xad   :  { %1248 = vmatprep.subr.bf16.mxu0 %v1647_v0 }
  0xb0   :  { %1249 = vmatpush3.bf16.msra.mxu0 %v1328_v17  ;;  %v1368_v17 = vld [vmem:[#allocation11 + $0x40] ss:$8 sps:$4 sm:$0xff]  }
  0xb1   :  { %1250 = vmatprep.subr.bf16.mxu0 %v1647_v0 }
  0xb4   :  { %1251 = vmatpush3.bf16.msra.mxu0 %v1329_v18 }
  0xb5   :  { %1252 = vmatprep.subr.bf16.mxu0 %v1647_v0 }
  0xb8   :  { %1253 = vmatpush3.bf16.msra.mxu0 %v1330_v19  ;;  %v1373_v19 = vld [vmem:[#allocation11 + $0x54] ss:$8 sps:$4 sm:$0xff]  }
  0xb9   :  { %1254 = vmatprep.subr.bf16.mxu0 %v1647_v0 }
  0xbc   :  { %1255 = vmatpush3.bf16.msra.mxu0 %v1331_v20  ;;  %v1371_v20 = vld [vmem:[#allocation11 + $0x50] ss:$8 sps:$4 sm:$0xff]  }
  0xbd   :  { %1260 = vmatprep.subr.bf16.mxu0 %v1647_v0 }
  0xbf   :  { %1257 = vmatmul.mubr.bf16.vlgmr.msra.gmra.mrb[4].mxu0 %v425_v22  ;;  %v1376_v22 = vld [vmem:[#allocation11 + $0x64] ss:$8 sps:$4 sm:$0xff]  }
  0xc0   :  { %1276 = vmatprep.mubr.msk.bf16.mxu0 %vm1648_vm0, %v1647_v0  ;;  %1261 = vmatpush3.bf16.msra.mxu0 %v1380_v39  ;;  %v1393_v39 = vld [vmem:[#allocation7 + $0x68] sm:$0xff]  }
  0xc1   :  { %1262 = vmatprep.subr.bf16.mxu0 %v1647_v0 }
  0xc4   :  { %1263 = vmatpush3.bf16.msra.mxu0 %v1381_v40  ;;  %v1394_v40 = vld [vmem:[#allocation7 + $0x70] sm:$0xff]  }
  0xc5   :  { %1264 = vmatprep.subr.bf16.mxu0 %v1647_v0 }
  0xc8   :  { %1265 = vmatpush3.bf16.msra.mxu0 %v1382_v41  ;;  %v1395_v41 = vld [vmem:[#allocation7 + $0x78] sm:$0xff]  }
  0xc9   :  { %1266 = vmatprep.subr.bf16.mxu0 %v1647_v0 }
  0xcc   :  { %1267 = vmatpush3.bf16.msra.mxu0 %v1383_v42  ;;  %v276_v42 = vlaneseq }
  0xcd   :  { %1268 = vmatprep.subr.bf16.mxu0 %v1647_v0 }
  0xd0   :  { %1269 = vmatpush3.bf16.msra.mxu0 %v1384_v43  ;;  %v277_v43 = vshrl.u32 %v276_v42, 7 }
  0xd1   :  { %1270 = vmatprep.subr.bf16.mxu0 %v1647_v0 }
  0xd4   :  { %1271 = vmatpush3.bf16.msra.mxu0 %v1385_v44  ;;  %v1879_v44 = vsub.s32 0, %v277_v43 }
  0xd5   :  { %1272 = vmatprep.subr.bf16.mxu0 %v1647_v0 }
  0xd8   :  { %1273 = vmatpush3.bf16.msra.mxu0 %v1386_v32 }
  0xd9   :  { %1274 = vmatprep.subr.bf16.mxu0 %v1647_v0 }
  0xdc   :  { %1275 = vmatpush3.bf16.msra.mxu0 %v1387_v33 }
 0x172   :  { %v242_v46 = vpop.f32.mrb[0].mxu0 }
 0x173   :  { %v243_v47 = vadd.f32 %v1099_v45, %v242_v46  ;;  %v1238_v48 = vpop.f32.mrb[1].mxu0  ;;  %v274_v45 = vld [vmem:[%s1936_s6] sm:$0x3]  ;;  %v1884_v46 = vsub.s32 1, %v277_v43 }
 0x174   :  { %v245_v49 = vpop.f32.mrb[2].mxu0 }
 0x175   :  { %v249_v50 = vmul.f32 0.044715, %v243_v47  ;;  %v1239_v51 = vpop.f32.mrb[3].mxu0  ;;  %v248_v57 = vmul.f32 0.5, %v243_v47  ;;  %v283_v48 = vrot.slane %v274_v45, %v1884_v46 }
 0x177   :  { %v250_v52 = vmul.f32 %v249_v50, %v243_v47 }
 0x179   :  { %v251_v53 = vmul.f32 %v250_v52, %v243_v47 }
 0x17b   :  { %v252_v54 = vadd.f32 %v251_v53, %v243_v47  ;;  %v279_v47 = vrot.slane %v274_v45, %v1879_v44 }
 0x17d   :  { %v253_v55 = vmul.f32 0.7978846, %v252_v54 }
 0x17f   :  { %1420 = vtanh.f32 %v253_v55 }
 0x189   :  { %v1421_v56 = vpop.eup %1420 }
 0x18a   :  { %v255_v58 = vadd.f32 1.0, %v1421_v56 }
 0x18c   :  { %v256_v59 = vmul.f32 %v255_v58, %v248_v57  ;;  %v548_v57 = vld [vmem:[%s1938_s8] sm:$0x3] }
 0x18d   :  { %v553_v58 = vrot.slane %v548_v57, %v1879_v44 }
 0x18e   :  { %v273_v61 = vpack.c.bf16 %v256_v59, %v256_v59  ;;  %v557_v59 = vrot.slane %v548_v57, %v1884_v46 }
 0x190   :  { %399 = vmatmul.mubr.bf16.vlgmr.msra.gmra.mrb[0].mxu1 %v273_v61 }
 0x191   :  { %641 = vmatpush1.bf16.msra.mxu1 %v1356_v60  ;;  %672 = vmatprep.mubr.bf16.mxu1 %v1649_v30 }
 0x192   :  { %v516_v2 = vpop.f32.mrb[4].mxu0  ;;  %642 = vmatprep.subr.bf16.mxu1 %v1361_v62 }
 0x193   :  { %v517_v4 = vadd.f32 %v1125_v63, %v516_v2  ;;  %v1258_v5 = vpop.f32.mrb[5].mxu0 }
 0x194   :  { %v519_v6 = vpop.f32.mrb[6].mxu0 }
 0x195   :  { %v523_v7 = vmul.f32 0.044715, %v517_v4  ;;  %v1259_v8 = vpop.f32.mrb[7].mxu0  ;;  %643 = vmatpush1.bf16.msra.mxu1 %v1359_v1  ;;  %v522_v27 = vmul.f32 0.5, %v517_v4  ;;  %v1396_v6 = vld [vmem:[#allocation13] ss:$8 sps:$4 sm:$0xff]  }
 0x196   :  { %644 = vmatprep.subr.bf16.mxu1 %v1364_v3  ;;  %v1399_v8 = vld [vmem:[#allocation13 + $0x10] ss:$8 sps:$4 sm:$0xff]  }
 0x197   :  { %v524_v12 = vmul.f32 %v523_v7, %v517_v4  ;;  %v1401_v7 = vld [vmem:[#allocation13 + $0x14] ss:$8 sps:$4 sm:$0xff]  }
 0x199   :  { %v525_v13 = vmul.f32 %v524_v12, %v517_v4  ;;  %645 = vmatpush1.bf16.msra.mxu1 %v1362_v9  ;;  %v1404_v9 = vld [vmem:[#allocation13 + $0x24] ss:$8 sps:$4 sm:$0xff]   ;;  %v1405_v12 = vld [vmem:[#allocation13 + $0x30] ss:$8 sps:$4 sm:$0xff]  }
 0x19a   :  { %646 = vmatprep.subr.bf16.mxu1 %v1367_v10  ;;  %v1402_v10 = vld [vmem:[#allocation13 + $0x20] ss:$8 sps:$4 sm:$0xff]  }
 0x19b   :  { %v526_v16 = vadd.f32 %v525_v13, %v517_v4  ;;  %v1407_v13 = vld [vmem:[#allocation13 + $0x34] ss:$8 sps:$4 sm:$0xff]  }
 0x19d   :  { %647 = vmatpush1.bf16.msra.mxu1 %v1365_v14  ;;  %v527_v18 = vmul.f32 0.7978846, %v526_v16  ;;  %v1410_v14 = vld [vmem:[#allocation13 + $0x44] ss:$8 sps:$4 sm:$0xff]   ;;  %v1413_v16 = vld [vmem:[#allocation13 + $0x54] ss:$8 sps:$4 sm:$0xff]  }
 0x19e   :  { %648 = vmatprep.subr.bf16.mxu1 %v1370_v15  ;;  %v1408_v15 = vld [vmem:[#allocation13 + $0x40] ss:$8 sps:$4 sm:$0xff]  }
 0x19f   :  { %1422 = vtanh.f32 %v527_v18  ;;  %v1416_v18 = vld [vmem:[#allocation13 + $0x64] ss:$8 sps:$4 sm:$0xff]  }
 0x1a1   :  { %649 = vmatpush1.bf16.msra.mxu1 %v1368_v17  ;;  %v1411_v17 = vld [vmem:[#allocation13 + $0x50] ss:$8 sps:$4 sm:$0xff]  }
 0x1a2   :  { %650 = vmatprep.subr.bf16.mxu1 %v1373_v19  ;;  %v1414_v19 = vld [vmem:[#allocation13 + $0x60] ss:$8 sps:$4 sm:$0xff]  }
 0x1a5   :  { %651 = vmatpush1.bf16.msra.mxu1 %v1371_v20  ;;  %v1419_v20 = vld [vmem:[#allocation13 + $0x74] ss:$8 sps:$4 sm:$0xff]  }
 0x1a6   :  { %652 = vmatprep.subr.bf16.mxu1 %v1376_v22  ;;  %v1417_v22 = vld [vmem:[#allocation13 + $0x70] ss:$8 sps:$4 sm:$0xff]  }
 0x1a9   :  { %v1423_v25 = vpop.eup %1422  ;;  %653 = vmatpush1.bf16.msra.mxu1 %v1374_v23 }
 0x1aa   :  { %654 = vmatprep.subr.bf16.mxu1 %v1379_v24  ;;  %v529_v28 = vadd.f32 1.0, %v1423_v25 }
 0x1ac   :  { %v530_v29 = vmul.f32 %v529_v28, %v522_v27  ;;  %v1167_v28 = vld [vmem:[%s1934_s4 + $0x2] ss:$0 sm:$0xff]  ;;  %s1650_s4 = smov [#allocation14]  }
 0x1ad   :  { %655 = vmatpush1.bf16.msra.mxu1 %v1377_v26  ;;  %s1073_s25 = sshll.u32 %s1650_s4, 4  ;;  %s1074_s25 = int_to_ptr.vmem [resolvable:$true] %s1073_s25 }
 0x1ae   :  { %v547_v31 = vpack.c.bf16 %v530_v29, %v530_v29  ;;  %1280 = vmatprep.subr.bf16.mxu1 %v1647_v0  ;;  %p1585_p1 = scmp.lt.s32.totalorder %s1074_s25, %s1074_s25 }
 0x1b0   :  { %673 = vmatmul.mubr.bf16.vlgmr.msra.gmra.mrb[4].mxu1 %v547_v31 }
 0x1b1   :  { %1296 = vmatprep.mubr.msk.bf16.mxu1 %vm1648_vm0, %v1647_v0  ;;  %1281 = vmatpush3.bf16.msra.mxu1 %v1388_v34 }
 0x1b2   :  { %1282 = vmatprep.subr.bf16.mxu1 %v1647_v0 }
 0x1b5   :  { %1283 = vmatpush3.bf16.msra.mxu1 %v1389_v35 }
 0x1b6   :  { %1284 = vmatprep.subr.bf16.mxu1 %v1647_v0 }
 0x1b9   :  { %1285 = vmatpush3.bf16.msra.mxu1 %v1390_v36 }
 0x1ba   :  { %1286 = vmatprep.subr.bf16.mxu1 %v1647_v0 }
 0x1bd   :  { %1287 = vmatpush3.bf16.msra.mxu1 %v1391_v37 }
 0x1be   :  { %1288 = vmatprep.subr.bf16.mxu1 %v1647_v0 }
 0x1c1   :  { %1289 = vmatpush3.bf16.msra.mxu1 %v1392_v38 }
 0x1c2   :  { %1290 = vmatprep.subr.bf16.mxu1 %v1647_v0 }
 0x1c5   :  { %1291 = vmatpush3.bf16.msra.mxu1 %v1393_v39 }
 0x1c6   :  { %1292 = vmatprep.subr.bf16.mxu1 %v1647_v0 }
 0x1c9   :  { %1293 = vmatpush3.bf16.msra.mxu1 %v1394_v40 }
 0x1ca   :  { %1294 = vmatprep.subr.bf16.mxu1 %v1647_v0 }
 0x1cd   :  { %1295 = vmatpush3.bf16.msra.mxu1 %v1395_v41 }
 0x263   :  { %v400_v49 = vpop.f32.mrb[0].mxu1 }
 0x264   :  { %v401_v50 = vadd.f32 %v400_v49, %v279_v47  ;;  %v402_v51 = vpop.f32.mrb[1].mxu1  ;;  %v930_v47 = vld [vmem:[%s1940_s10] sm:$0x3]  ;;  %s1580_s10 = scalar_lea.vmem %s1074_s25, 128 }
 0x265   :  { %v403_v0 = vadd.f32 %v402_v51, %v283_v48  ;;  %v404_v52 = vpop.f32.mrb[2].mxu1  ;;  %v935_v48 = vrot.slane %v930_v47, %v1879_v44  ;;  %v939_v49 = vrot.slane %v930_v47, %v1884_v46  ;;  %p1581_p0 = scmp.ne.s32.totalorder %s1074_s25, %s1580_s10  ;;  %p1586_p2 = scmp.lt.s32.totalorder %s1580_s10, %s1580_s10 }
 0x266   :  { %v407_v53 = vmul.f32 %v401_v50, %v1846_v21  ;;  %v405_v54 = vpop.f32.mrb[3].mxu1 }
 0x267   :  { %p1587_p3 = por %p1586_p2, %p1585_p1 }
 0x268   :  { %v408_v55 = vadd.f32 %v407_v53, %v403_v0 }
 0x269   :  { %p1588_p4 = pnand %p1587_p3, %p1581_p0 }
 0x26a   :  { %v718_v56 = vpack.c.bf16 %v408_v55, %v408_v55 }
 0x26c   :  { %1277 = vmatmul.mubr.bf16.vlgmr.msra.gmra.mrb[8].mxu0 %v718_v56 }
 0x26d   :  { %1054 = vmatprep.mubr.bf16.mxu0 %v1649_v30  ;;  %v1398_v30 = vld [vmem:[#allocation13 + $0x4] ss:$8 sps:$4 sm:$0xff]  }
 0x26e   :  { %1022 = vmatprep.subr.bf16.mxu0 %v1398_v30 }
 0x26f   :  { %1023 = vmatpush1.bf16.msra.mxu0 %v1396_v6 }
 0x270   :  { %1024 = vmatprep.subr.bf16.mxu0 %v1401_v7 }
 0x273   :  { %1025 = vmatpush1.bf16.msra.mxu0 %v1399_v8 }
 0x274   :  { %1026 = vmatprep.subr.bf16.mxu0 %v1404_v9 }
 0x277   :  { %1027 = vmatpush1.bf16.msra.mxu0 %v1402_v10 }
 0x278   :  { %1028 = vmatprep.subr.bf16.mxu0 %v1407_v13 }
 0x27b   :  { %1029 = vmatpush1.bf16.msra.mxu0 %v1405_v12 }
 0x27c   :  { %1030 = vmatprep.subr.bf16.mxu0 %v1410_v14 }
 0x27f   :  { %1031 = vmatpush1.bf16.msra.mxu0 %v1408_v15 }
 0x280   :  { %1032 = vmatprep.subr.bf16.mxu0 %v1413_v16 }
 0x283   :  { %v674_v60 = vpop.f32.mrb[4].mxu1  ;;  %1033 = vmatpush1.bf16.msra.mxu0 %v1411_v17 }
 0x284   :  { %v675_v61 = vadd.f32 %v674_v60, %v553_v58  ;;  %v676_v62 = vpop.f32.mrb[5].mxu1  ;;  %1034 = vmatprep.subr.bf16.mxu0 %v1416_v18 }
 0x285   :  { %v677_v63 = vadd.f32 %v676_v62, %v557_v59  ;;  %v678_v1 = vpop.f32.mrb[6].mxu1 }
 0x286   :  { %v681_v2 = vmul.f32 %v675_v61, %v1832_v11  ;;  %v679_v3 = vpop.f32.mrb[7].mxu1 }
 0x287   :  { %1035 = vmatpush1.bf16.msra.mxu0 %v1414_v19 }
 0x288   :  { %v682_v4 = vadd.f32 %v681_v2, %v677_v63  ;;  %1036 = vmatprep.subr.bf16.mxu0 %v1419_v20 }
 0x28a   :  { %v700_v5 = vpack.c.bf16 %v682_v4, %v682_v4 }
 0x28b   :  { %1037 = vmatpush1.bf16.msra.mxu0 %v1417_v22 }
 0x28c   :  { %1297 = vmatmul.mubr.bf16.vlgmr.msra.gmra.mrb[8].mxu1 %v700_v5 }
 0x33f   :  { %v801_v23 = vpop.f32.mrb[8].mxu0 }
 0x340   :  { %v1278_v24 = vpop.f32.mrb[9].mxu0 }
 0x341   :  { %v804_v25 = vpop.f32.mrb[10].mxu0 }
 0x342   :  { %v1279_v26 = vpop.f32.mrb[11].mxu0 }
 0x35f   :  { %v889_v27 = vpop.f32.mrb[8].mxu1 }
 0x360   :  { %v890_v29 = vadd.f32 %v889_v27, %v801_v23  ;;  %v1298_v31 = vpop.f32.mrb[9].mxu1 }
 0x361   :  { %v892_v32 = vpop.f32.mrb[10].mxu1 }
 0x362   :  { %v903_v33 = vadd.f32 %v1167_v28, %v890_v29  ;;  %v1299_v34 = vpop.f32.mrb[11].mxu1 }
 0x364   :  { %v905_v35 = vmul.f32 0.044715, %v903_v33  ;;  %v904_v41 = vmul.f32 0.5, %v903_v33 }
 0x366   :  { %v906_v36 = vmul.f32 %v905_v35, %v903_v33 }
 0x368   :  { %v907_v37 = vmul.f32 %v906_v36, %v903_v33 }
 0x36a   :  { %v908_v38 = vadd.f32 %v907_v37, %v903_v33 }
 0x36c   :  { %v909_v39 = vmul.f32 0.7978846, %v908_v38 }
 0x36e   :  { %1424 = vtanh.f32 %v909_v39 }
 0x378   :  { %v1425_v40 = vpop.eup %1424 }
 0x379   :  { %v911_v42 = vadd.f32 1.0, %v1425_v40 }
 0x37b   :  { %v912_v43 = vmul.f32 %v911_v42, %v904_v41 }
 0x37d   :  { %v929_v45 = vpack.c.bf16 %v912_v43, %v912_v43 }
 0x37f   :  { %1055 = vmatmul.mubr.bf16.vlgmr.msra.gmra.mrb[12].mxu0 %v929_v45 }
 0x452   :  { %v1056_v50 = vpop.f32.mrb[12].mxu0 }
 0x453   :  { %v1057_v51 = vadd.f32 %v1056_v50, %v935_v48  ;;  %v1058_v0 = vpop.f32.mrb[13].mxu0 }
 0x454   :  { %v1059_v52 = vadd.f32 %v1058_v0, %v939_v49  ;;  %v1060_v53 = vpop.f32.mrb[14].mxu0 }
 0x455   :  { %v1063_v54 = vadd.f32 %v1057_v51, %v1832_v11  ;;  %v1061_v55 = vpop.f32.mrb[15].mxu0 }
 0x456   :  { %v1065_v56 = vadd.f32 %v1059_v52, %v1846_v21 }
 0x457   :  { %1064 = vst [vmem:[#allocation14] sm:$0xff] %v1063_v54 }
 0x458   :  { %1066 = vst [vmem:[#allocation15] sm:$0xff] %v1065_v56 }
 0x459   :  { %1591 = shalt.err (!%p1588_p4)
}
 0x45a   :  { %s1592_s26 = scalar_lea.hbm %s1941_s11, 128 }
 0x45b   :  { %p1593_p5 = scmp.ne.s32.totalorder %s1941_s11, %s1592_s26  ;;  %p1596_p6 = scmp.lt.u32.totalorder %s1592_s26, %s1941_s11 }
 0x45d   :  { %p1598_p7 = pnand %p1596_p6, %p1593_p5 }
 0x45f   :  { %1601 = shalt.err (!%p1598_p7)
}
 0x460   :  { %1076 = dma.vmem_to_hbm [thread:$0]  %s1074_s25, 128, %s1941_s11, [#allocation4]  }
 0x461   :  { %s1602_s15 = scalar_lea.vmem %s1084_s1, 128  ;;  %p1607_p9 = scmp.lt.s32.totalorder %s1084_s1, %s1084_s1 }
 0x462   :  { %p1603_p8 = scmp.ne.s32.totalorder %s1084_s1, %s1602_s15  ;;  %p1608_p10 = scmp.lt.s32.totalorder %s1602_s15, %s1602_s15 }
 0x464   :  { %p1609_p11 = por %p1608_p10, %p1607_p9 }
 0x466   :  { %p1610_p12 = pnand %p1609_p11, %p1603_p8 }
 0x468   :  { %1613 = shalt.err (!%p1610_p12)
}
 0x469   :  { %s1614_s9 = scalar_lea.hbm %s1942_s12, 128 }
 0x46a   :  { %p1615_p13 = scmp.ne.s32.totalorder %s1942_s12, %s1614_s9  ;;  %p1618_p0 = scmp.lt.u32.totalorder %s1614_s9, %s1942_s12 }
 0x46c   :  { %p1620_p1 = pnand %p1618_p0, %p1615_p13 }
 0x46e   :  { %1623 = shalt.err (!%p1620_p1)
}
 0x46f   :  { %1086 = dma.vmem_to_hbm [thread:$0]  %s1084_s1, 128, %s1942_s12, [#allocation16]  }
 0x470   :  { %1632 = dma.done.wait [#allocation4], 128  }
 0x471   :  { %1633 = vsyncadd [#allocation4], 4294967168 }
 0x472   :  { %1634 = dma.done.wait [#allocation16], 128  }
 0x473   :  { %1635 = vsyncadd [#allocation16], 4294967168 }
 0x474   :  { %1093 = vsyncpa [#allocation3], 1 }
 0x475   :  { %1094 = vsyncpa [#allocation6], 1 }
 0x476   :  { %1095 = vsyncpa [#allocation9], 1 }
 0x477   :  { %1096 = vsyncpa [#allocation12], 1 }
 0x478   :  { %1097 = vsyncpa [#allocation4], 1 }
 0x479   :  { %1098 = vsyncpa [#allocation16], 1 }

</bundles_post_ra>
